<compile_context>
chip_gen: v7x
topology: tpu7x:2x2x1
jax: 0.10.0
libtpu: 0.0.40
codegen_flags: <defaults>
</compile_context>

<pallas_src>
import jax
import jax.numpy as jnp
from jax.experimental import pallas as pl
from jax.experimental.pallas import tpu as pltpu


def _round_up(x, m):
    return (x + m - 1) // m * m


def _pick_tile(size, unit, max_tile):
    """Pick a tile (multiple of `unit`, <= max_tile) for one dimension.

    Prefers tiles that divide the unit-rounded size exactly (zero padding
    waste); otherwise the largest tile wasting <= 12.5% padding.
    Returns (tile, padded_size).
    """
    size_p = _round_up(size, unit)
    max_tile = max(unit, min(max_tile, size_p) // unit * unit)
    if size_p <= max_tile:
        return size_p, size_p
    for t in range(max_tile, unit - 1, -unit):          # exact divisors first
        if size_p % t == 0 and 2 * t >= max_tile:
            return t, size_p
    for t in range(max_tile, unit - 1, -unit):          # <= 12.5% waste
        padded = _round_up(size_p, t)
        if (padded - size_p) * 8 <= padded:
            return t, padded
    return max_tile, _round_up(size_p, max_tile)


def _make_kernel(deg_col):
    def kernel(adj_ref, feat_src_ref, feat_dst_ref, w_ref, b_ref,
               out_ref, agg_ref):
        # adj_ref:      (TN, TK)    int8/bf16 adjacency tile (dst x src)
        # feat_src_ref: (TK, DIa)   bf16 src features + all-ones lane deg_col
        # feat_dst_ref: (TN, DIa)   bf16 dst features (zeros in lane deg_col)
        # w_ref:        (DIa, DOp)  bf16 fc weight^T (row deg_col is zero)
        # b_ref:        (1, DOp)    f32 fc bias
        # out_ref:      (TN, DOp)   f32 output tile
        # agg_ref:      (TN, DIa)   f32 scratch: [adj @ feat_src | in-degree]
        k = pl.program_id(1)

        @pl.when(k == 0)
        def _init():
            agg_ref[...] = jnp.zeros_like(agg_ref)

        # 0/1 adjacency -> bf16 is exact; MXU accumulates in f32.  The ones
        # lane of feat_src makes column `deg_col` of agg the in-degree, so no
        # separate VPU cast / XLU row-reduce is needed.
        adj = adj_ref[...].astype(jnp.bfloat16)
        agg_ref[...] += jnp.dot(adj, feat_src_ref[...],
                                preferred_element_type=jnp.float32)

        @pl.when(k == pl.num_programs(1) - 1)
        def _finalize():
            agg = agg_ref[...]
            deg = agg[:, deg_col:deg_col + 1]                # adj @ ones
            inv = pl.reciprocal(deg + 1.0, approx=True)      # EUP slot
            h_neigh = (agg + feat_dst_ref[...].astype(jnp.float32)) * inv
            rst = jnp.dot(h_neigh.astype(jnp.bfloat16), w_ref[...],
                          preferred_element_type=jnp.float32) + b_ref[...]
            out_ref[...] = rst.astype(out_ref.dtype)

    return kernel


def dense_sage_conv(adj, feat_src, feat_dst, weight, bias, *,
                    max_tile_n=512, max_tile_k=2048,
                    vmem_budget_bytes=32 << 20):
    """DenseSAGEConv forward (gcn aggregator).

    adj:      (N_out, N_in)  dense adjacency, row = destination node
              (int8 / bool / bf16 / f32; 0-1 entries stream exactly as int8)
    feat_src: (N_in, D_in)
    feat_dst: (N_out, D_in)
    weight:   (D_out, D_in)  PyTorch nn.Linear layout
    bias:     (D_out,)
    Returns   (N_out, D_out) float32.
    """
    n_out, n_in = adj.shape
    d_in = feat_src.shape[1]
    d_out = weight.shape[0]

    # Feature-lane padding; reserve one lane for the fused in-degree column
    # (fresh 128-lane block when D_in is already lane-aligned).
    d_in_p = _round_up(d_in, 128)
    d_in_aug = d_in_p if d_in_p > d_in else d_in + 128
    deg_col = d_in
    d_out_p = _round_up(d_out, 128)

    # adj storage dtype: int8 for 0/1 graphs (minimal HBM traffic), bf16 if a
    # weighted floating adjacency is supplied.
    if adj.dtype == jnp.int8 or adj.dtype == jnp.bfloat16:
        adj_st = adj
    elif jnp.issubdtype(adj.dtype, jnp.floating):
        adj_st = adj.astype(jnp.bfloat16)
    else:
        adj_st = adj.astype(jnp.int8)
    adj_bytes = adj_st.dtype.itemsize

    # Tiles that divide the 32/128-rounded sizes (32-row alignment keeps
    # int8/bf16 sublane packing clean; 128 is the lane unit on adj's K dim).
    tile_k, n_in_p = _pick_tile(n_in, 128, max_tile_k)
    tile_n, n_out_p = _pick_tile(n_out, 32, max_tile_n)

    def vmem_use(tn, tk):
        return (2 * (tn * tk * adj_bytes            # adj tile (double-buffered)
                     + tk * d_in_aug * 2            # feat_src tile
                     + tn * d_in_aug * 2            # feat_dst tile
                     + tn * d_out_p * 4)            # out tile (f32)
                + 2 * d_in_aug * d_out_p * 2        # resident weight (2 bufs)
                + 2 * 8 * d_out_p * 4               # resident bias
                + tn * d_in_aug * 4)                # agg scratch

    # Shrink tiles until the footprint fits; prefer shrinking tile_k first
    # (cheap: feat_src traffic depends on the row-tile count, not tile_k).
    while vmem_use(tile_n, tile_k) > vmem_budget_bytes:
        if tile_k > 512:
            tile_k, n_in_p = _pick_tile(n_in, 128, tile_k // 2)
        elif tile_n > 64:
            tile_n, n_out_p = _pick_tile(n_out, 32, tile_n // 2)
        elif tile_k > 128:
            tile_k, n_in_p = _pick_tile(n_in, 128, tile_k // 2)
        else:
            break

    def pad2(x, rows, cols, dtype=None):
        if dtype is not None and x.dtype != dtype:
            x = x.astype(dtype)
        pr, pc = rows - x.shape[0], cols - x.shape[1]
        if pr or pc:
            x = jnp.pad(x, ((0, pr), (0, pc)))
        return x

    adj_p = pad2(adj_st, n_out_p, n_in_p)               # no-op when aligned
    fsrc_p = pad2(feat_src, n_in_p, d_in_aug, jnp.bfloat16)
    fsrc_p = fsrc_p.at[:n_in, deg_col].set(1.0)          # adj @ 1 == in-degree
    fdst_p = pad2(feat_dst, n_out_p, d_in_aug, jnp.bfloat16)
    w_p = pad2(weight.T, d_in_aug, d_out_p, jnp.bfloat16)  # deg row is zero
    b_p = jnp.pad(bias.astype(jnp.float32),
                  (0, d_out_p - d_out)).reshape(1, d_out_p)

    grid = (n_out_p // tile_n, n_in_p // tile_k)
    vmem_limit = int(min(max(vmem_use(tile_n, tile_k) + (4 << 20), 16 << 20),
                         40 << 20))   # 40 MiB cap also fits v7x's 64 MiB VMEM

    out_p = pl.pallas_call(
        _make_kernel(deg_col),
        out_shape=jax.ShapeDtypeStruct((n_out_p, d_out_p), jnp.float32),
        grid_spec=pltpu.PrefetchScalarGridSpec(
            num_scalar_prefetch=0,
            grid=grid,
            in_specs=[
                pl.BlockSpec((tile_n, tile_k), lambda i, k: (i, k)),      # adj
                pl.BlockSpec((tile_k, d_in_aug), lambda i, k: (k, 0)),    # feat_src
                pl.BlockSpec((tile_n, d_in_aug), lambda i, k: (i, 0)),    # feat_dst
                pl.BlockSpec((d_in_aug, d_out_p), lambda i, k: (0, 0)),   # weight^T
                pl.BlockSpec((1, d_out_p), lambda i, k: (0, 0)),          # bias
            ],
            out_specs=pl.BlockSpec((tile_n, d_out_p), lambda i, k: (i, 0)),
            scratch_shapes=[
                pltpu.VMEM((tile_n, d_in_aug), jnp.float32),   # agg (+degree)
            ],
        ),
        compiler_params=pltpu.CompilerParams(
            dimension_semantics=("parallel", "arbitrary"),
            vmem_limit_bytes=vmem_limit,
        ),
    )(adj_p, fsrc_p, fdst_p, w_p, b_p)

    return out_p[:n_out, :d_out]


def _glorot_uniform(key, shape, gain):
    # xavier_uniform_ with gain: U(-a, a), a = gain * sqrt(6 / (fan_in + fan_out))
    fan_out, fan_in = shape  # nn.Linear weight is (out_feats, in_feats)
    a = gain * (6.0 / (fan_in + fan_out)) ** 0.5
    return jax.random.uniform(key, shape, minval=-a, maxval=a, dtype=jnp.float32)


if __name__ == "__main__":
    # Small deterministic homo-graph example with non-lane-aligned feature
    # sizes: N = 640 nodes, D_in = 96, D_out = 40.
    N, D_IN, D_OUT = 640, 96, 40
    key = jax.random.PRNGKey(0)
    k_adj, k_feat, k_w, k_b = jax.random.split(key, 4)

    # 0/1 adjacency supplied directly as int8 (exact; no wrapper dtype pass).
    adj = (jax.random.uniform(k_adj, (N, N)) < 0.1).astype(jnp.int8)
    feat = jax.random.normal(k_feat, (N, D_IN), dtype=jnp.float32)

    gain = 2.0 ** 0.5  # nn.init.calculate_gain('relu')
    weight = _glorot_uniform(k_w, (D_OUT, D_IN), gain)
    bound = 1.0 / (D_IN ** 0.5)  # nn.Linear default bias init
    bias = jax.random.uniform(k_b, (D_OUT,), minval=-bound, maxval=bound,
                              dtype=jnp.float32)

    # Pure-JAX f32 reference of the forward semantics.  The kernel feeds the
    # MXU bf16 features/weights and uses an approximate reciprocal, so
    # tolerances are relaxed a bit (adj and the degree are exact).
    adj_f = adj.astype(jnp.float32)
    in_deg = adj_f.sum(axis=1, keepdims=True)
    h_neigh = (adj_f @ feat + feat) / (in_deg + 1.0)
    ref = h_neigh @ weight.T + bias

    # 1) Default tiling: whole-N_in K tile (feat_src read once), 2 row tiles
    #    of 320 (even split across v7x's two TensorCores).
    out = jax.block_until_ready(dense_sage_conv(adj, feat, feat, weight, bias))
    assert out.shape == (N, D_OUT)
    err = jnp.max(jnp.abs(out - ref))
    assert jnp.allclose(out, ref, atol=5e-2, rtol=5e-2), (
        f"default tiling mismatch vs reference, max abs err = {err}")

    # 2) Forced small tiles: exercises the K-accumulation path (grid = (4, 5)).
    out2 = jax.block_until_ready(
        dense_sage_conv(adj, feat, feat, weight, bias,
                        max_tile_n=256, max_tile_k=256))
    err2 = jnp.max(jnp.abs(out2 - ref))
    assert jnp.allclose(out2, ref, atol=5e-2, rtol=5e-2), (
        f"tiled-K mismatch vs reference, max abs err = {err2}")

    print("KERNEL_OK")
</pallas_src>

<mosaic_0001>
module attributes {stable_mosaic.version = 11 : i64} {
  func.func @kernel(%arg0: i32, %arg1: i32, %arg2: memref<320x640xi8, #tpu.memory_space<vmem>>, %arg3: memref<640x128xbf16, #tpu.memory_space<vmem>>, %arg4: memref<320x128xbf16, #tpu.memory_space<vmem>>, %arg5: memref<128x128xbf16, #tpu.memory_space<vmem>>, %arg6: memref<1x128xf32, #tpu.memory_space<vmem>>, %arg7: memref<320x128xf32, #tpu.memory_space<vmem>>, %arg8: memref<320x128xf32, #tpu.memory_space<vmem>>) attributes {dimension_semantics = [#tpu.dimension_semantics<parallel>, #tpu.dimension_semantics<arbitrary>], iteration_bounds = array<i64: 2, 1>, scalar_prefetch = 0 : i64, scratch_operands = 1 : i64, tpu.core_type = #tpu.core_type<tc>, window_params = [{transform_indices = @transform_0, window_bounds = array<i64: 320, 640>}, {transform_indices = @transform_1, window_bounds = array<i64: 640, 128>}, {transform_indices = @transform_2, window_bounds = array<i64: 320, 128>}, {pipeline_mode = #tpu.pipeline_mode<synchronous>, transform_indices = @transform_3, window_bounds = array<i64: 128, 128>}, {pipeline_mode = #tpu.pipeline_mode<synchronous>, transform_indices = @transform_4, window_bounds = array<i64: 1, 128>}, {transform_indices = @transform_5, window_bounds = array<i64: 320, 128>}]} {
    %c0_i32 = arith.constant 0 : i32
    %0 = arith.cmpi eq, %arg1, %c0_i32 : i32
    %1 = arith.extui %0 : i1 to i32
    %c0_i32_0 = arith.constant 0 : i32
    %2 = arith.cmpi ne, %1, %c0_i32_0 : i32
    scf.if %2 {
      %cst_10 = arith.constant 0.000000e+00 : f32
      %13 = vector.broadcast %cst_10 : f32 to vector<320x128xf32>
      %c0_11 = arith.constant 0 : index
      %c0_12 = arith.constant 0 : index
      %14 = vector.load %arg8[%c0_11, %c0_12] : memref<320x128xf32, #tpu.memory_space<vmem>>, vector<320x128xf32>
      tpu.vector_store %arg8[%c0_11, %c0_12], %13 {strides = array<i32>} : memref<320x128xf32, #tpu.memory_space<vmem>>, vector<320x128xf32>,
    } else {
    }
    %c0 = arith.constant 0 : index
    %c0_1 = arith.constant 0 : index
    %3 = vector.load %arg2[%c0, %c0_1] : memref<320x640xi8, #tpu.memory_space<vmem>>, vector<320x640xi8>
    %4 = arith.sitofp %3 : vector<320x640xi8> to vector<320x640xbf16>
    %c0_2 = arith.constant 0 : index
    %c0_3 = arith.constant 0 : index
    %5 = vector.load %arg8[%c0_2, %c0_3] : memref<320x128xf32, #tpu.memory_space<vmem>>, vector<320x128xf32>
    %c0_4 = arith.constant 0 : index
    %c0_5 = arith.constant 0 : index
    %6 = vector.load %arg3[%c0_4, %c0_5] : memref<640x128xbf16, #tpu.memory_space<vmem>>, vector<640x128xbf16>
    %cst = arith.constant dense<0.000000e+00> : vector<320x128xf32>
    %7 = tpu.matmul %4, %6, %cst {dimension_numbers = #tpu.dot_dimension_numbers<[1], [0], [0], [1], [0, 0, 1, 1], [], []>} : vector<320x640xbf16>, vector<640x128xbf16>, vector<320x128xf32> -> vector<320x128xf32>
    %8 = arith.addf %5, %7 : vector<320x128xf32>
    %c0_6 = arith.constant 0 : index
    %c0_7 = arith.constant 0 : index
    %9 = vector.load %arg8[%c0_6, %c0_7] : memref<320x128xf32, #tpu.memory_space<vmem>>, vector<320x128xf32>
    tpu.vector_store %arg8[%c0_6, %c0_7], %8 {strides = array<i32>} : memref<320x128xf32, #tpu.memory_space<vmem>>, vector<320x128xf32>,
    %c0_i32_8 = arith.constant 0 : i32
    %10 = arith.cmpi eq, %arg1, %c0_i32_8 : i32
    %11 = arith.extui %10 : i1 to i32
    %c0_i32_9 = arith.constant 0 : i32
    %12 = arith.cmpi ne, %11, %c0_i32_9 : i32
    scf.if %12 {
      %c0_10 = arith.constant 0 : index
      %c0_11 = arith.constant 0 : index
      %13 = vector.load %arg8[%c0_10, %c0_11] : memref<320x128xf32, #tpu.memory_space<vmem>>, vector<320x128xf32>
      %14 = vector.extract_strided_slice %13 {offsets = [0, 96], sizes = [320, 1], strides = [1, 1]} : vector<320x128xf32> to vector<320x1xf32>
      %cst_12 = arith.constant 1.000000e+00 : f32
      %15 = vector.broadcast %cst_12 : f32 to vector<320x1xf32>
      %16 = arith.addf %14, %15 : vector<320x1xf32>
      %17 = tpu.reciprocal %16 {approx = true} : vector<320x1xf32> -> vector<320x1xf32>
      %c0_13 = arith.constant 0 : index
      %c0_14 = arith.constant 0 : index
      %18 = vector.load %arg4[%c0_13, %c0_14] : memref<320x128xbf16, #tpu.memory_space<vmem>>, vector<320x128xbf16>
      %19 = arith.extf %18 : vector<320x128xbf16> to vector<320x128xf32>
      %20 = arith.addf %13, %19 : vector<320x128xf32>
      %21 = vector.broadcast %17 : vector<320x1xf32> to vector<320x128xf32>
      %22 = arith.mulf %20, %21 : vector<320x128xf32>
      %23 = arith.truncf %22 : vector<320x128xf32> to vector<320x128xbf16>
      %c0_15 = arith.constant 0 : index
      %c0_16 = arith.constant 0 : index
      %24 = vector.load %arg5[%c0_15, %c0_16] : memref<128x128xbf16, #tpu.memory_space<vmem>>, vector<128x128xbf16>
      %cst_17 = arith.constant dense<0.000000e+00> : vector<320x128xf32>
      %25 = tpu.matmul %23, %24, %cst_17 {dimension_numbers = #tpu.dot_dimension_numbers<[1], [0], [0], [1], [0, 0, 1, 1], [], []>} : vector<320x128xbf16>, vector<128x128xbf16>, vector<320x128xf32> -> vector<320x128xf32>
      %c0_18 = arith.constant 0 : index
      %c0_19 = arith.constant 0 : index
      %26 = vector.load %arg6[%c0_18, %c0_19] : memref<1x128xf32, #tpu.memory_space<vmem>>, vector<1x128xf32>
      %27 = vector.broadcast %26 : vector<1x128xf32> to vector<320x128xf32>
      %28 = arith.addf %25, %27 : vector<320x128xf32>
      %c0_20 = arith.constant 0 : index
      %c0_21 = arith.constant 0 : index
      %29 = vector.load %arg7[%c0_20, %c0_21] : memref<320x128xf32, #tpu.memory_space<vmem>>, vector<320x128xf32>
      tpu.vector_store %arg7[%c0_20, %c0_21], %28 {strides = array<i32>} : memref<320x128xf32, #tpu.memory_space<vmem>>, vector<320x128xf32>,
    } else {
    }
    return
  }
  func.func @transform_0(%arg0: i32, %arg1: i32) -> (i32, i32) {
    %c0_i32 = arith.constant 0 : i32
    return %arg0, %arg1 : i32, i32
  }
  func.func @transform_1(%arg0: i32, %arg1: i32) -> (i32, i32) {
    %c0_i32 = arith.constant 0 : i32
    %c0_i32_0 = arith.constant 0 : i32
    return %arg1, %c0_i32 : i32, i32
  }
  func.func @transform_2(%arg0: i32, %arg1: i32) -> (i32, i32) {
    %c0_i32 = arith.constant 0 : i32
    %c0_i32_0 = arith.constant 0 : i32
    return %arg0, %c0_i32 : i32, i32
  }
  func.func @transform_3(%arg0: i32, %arg1: i32) -> (i32, i32) {
    %c0_i32 = arith.constant 0 : i32
    %c0_i32_0 = arith.constant 0 : i32
    %c0_i32_1 = arith.constant 0 : i32
    return %c0_i32, %c0_i32_0 : i32, i32
  }
  func.func @transform_4(%arg0: i32, %arg1: i32) -> (i32, i32) {
    %c0_i32 = arith.constant 0 : i32
    %c0_i32_0 = arith.constant 0 : i32
    %c0_i32_1 = arith.constant 0 : i32
    return %c0_i32, %c0_i32_0 : i32, i32
  }
  func.func @transform_5(%arg0: i32, %arg1: i32) -> (i32, i32) {
    %c0_i32 = arith.constant 0 : i32
    %c0_i32_0 = arith.constant 0 : i32
    return %arg0, %c0_i32 : i32, i32
  }
}

</mosaic_0001>

<bundles_post_ra>
// kernel: tpu_custom_call.1
= control target key start
LH: loop header
LB: loop body
LE: loop exit
PB: predicated region body
PF: predicated region fallthrough
CT: control target
= control target key end

     0   :  { %s4223_s0 = inlined_call_operand.hbm [shape: s8[640,640], index: 0, kind: input, shape index: {}]   ;;  %s4224_s1 = inlined_call_operand.hbm [shape: bf16[640,128], index: 1, kind: input, shape index: {}]   ;;  %s4225_s2 = inlined_call_operand.hbm [shape: bf16[640,128], index: 2, kind: input, shape index: {}]   ;;  %s4226_s3 = inlined_call_operand.hbm [shape: bf16[128,128], index: 3, kind: input, shape index: {}]   ;;  %s4227_s4 = inlined_call_operand.vmem [shape: f32[1,128], index: 4, kind: input, shape index: {}]   ;;  %s4228_s5 = inlined_call_operand.hbm [shape: f32[640,128], index: 5, kind: output, shape index: {}]  }
   0x1   :  { %4254 = sst [smem:[#allocation29_spill]] %s4223_s0 }
   0x2   :  { %4255 = sst [smem:[#allocation30_spill]] %s4224_s1 }
   0x3   :  { %10 = vsyncpa [#allocation4], 0 }
   0x4   :  { %12 = vsyncpa [#allocation4 + $0x1], 0 }
   0x5   :  { %13 = vsyncpa [#allocation7], 0 }
   0x6   :  { %14 = vsyncpa [#allocation5], 0 }
   0x7   :  { %16 = vsyncpa [#allocation5 + $0x1], 0  ;;  %s3411_s18 = smov 0   ;;  %s3413_s19 = smov 0  }
   0x8   :  { %s3415_s20 = smov 0   ;;  %s3417_s21 = smov 0  }
   0x9   :  { %s3419_s22 = smov 0   ;;  %s3421_s23 = smov 0  }
   0xa LB: > { %4256 = sst [smem:[#allocation16_spill]] %s3354_s20  ;;  %s3442_s24 = sadd.s32 4294967295, %s3366_s23   ;;  %s3366_s23 = sphi %s3421_s23, %s22_s23   ;;  %s3362_s22 = sphi %s3419_s22, %s4311_s22   ;;  %s3358_s21 = sphi %s3417_s21, %s4310_s21   ;;  %s3354_s20 = sphi %s3415_s20, %s4309_s20   ;;  %s3350_s19 = sphi %s3413_s19, %s4308_s19   ;;  %s3346_s18 = sphi %s3411_s18, %s4307_s18  }
   0xb   : > { %4257 = sst [smem:[#allocation17_spill]] %s3366_s23  ;;  %s2500_s25 = sadd.s32 4294967294, %s3366_s23  }
   0xc   : > { %p56_p0 = scmp.ne.s32.totalorder %s3350_s19, %s3346_s18  ;;  %p4229_p1 = scmp.eq.s32.totalorder %s3442_s24, 0 }
   0xd   : > { %p180_p3 = scmp.eq.s32.totalorder %s2500_s25, 1  ;;  %p2501_p5 = scmp.ge.s32.totalorder %s3366_s23, 1 }
   0xe   : > { %p3451_p4 = por %p4229_p1, %p56_p0  ;;  %p187_p7 = scmp.lt.s32.totalorder %s3366_s23, 3 }
   0xf   : > { %p3456_p6 = por %p180_p3, %p56_p0  ;;  %s3368_s29 = smov [#allocation6]  }
  0x10   : > { %s4258_s26 = scalar_select %p3451_p4, 1, 0 }
  0x11   : > { %s4259_s27 = scalar_select %p3456_p6, 1, 0 }
  0x12   : > { %p3461_p8 = pnand %p2501_p5, %p187_p7  ;;  %s202_s30 = sshll.u32 %s3368_s29, 4  ;;  %s203_s30 = int_to_ptr.vmem [resolvable:$true] %s202_s30 }
  0x13   : > { %4260 = sst [smem:[#allocation18_spill]] %s4259_s27  ;;  %s34_s7 = sadd.s32 1, %s3362_s22 }
  0x14   : > { %s4261_s28 = scalar_select %p3461_p8, 1, 0 }
  0x15   : > { %p2943_p9 = pneg %p3461_p8  ;;  %s4263_s1 = sld [smem:[#allocation30_spill]] }
  0x17   : > { %p3470_p11 = pnand %p2943_p9, %p4229_p1 }
  0x19   : > { %p4237_p13 = pneg %p3470_p11 }
  0x1b   : > { %s3156_s10 = scalar_lea.hbm %s4263_s1, 5120 }
  0x1c   : > { %p3157_p12 = scmp.ne.s32.totalorder %s4263_s1, %s3156_s10  ;;  %p3163_p5 = scmp.lt.u32.totalorder %s3156_s10, %s4263_s1 }
  0x1e   : > { %p3159_p0 = pnand %p4237_p13, %p3157_p12 }
  0x20   : > { %p3160_p3 = pneg %p3159_p0 }
  0x22   : > { %p3165_p7 = pnand %p3163_p5, %p3160_p3 }
  0x24   : > { %3168 = shalt.err (!%p3165_p7)
}
  0x25   : > { %s3169_s15 = scalar_lea.vmem %s203_s30, 5120  ;;  %p3177_p2 = scmp.lt.s32.totalorder %s203_s30, %s203_s30 }
  0x26   : > { %p3170_p9 = scmp.ne.s32.totalorder %s203_s30, %s3169_s15  ;;  %p3178_p6 = scmp.lt.s32.totalorder %s3169_s15, %s3169_s15 }
  0x28   : > { %p3172_p10 = pnand %p3170_p9, %p4237_p13  ;;  %p3179_p4 = por %p3178_p6, %p3177_p2 }
  0x2a   : > { %p3173_p1 = pneg %p3172_p10 }
  0x2c   : > { %p3180_p8 = pnand %p3179_p4, %p3173_p1 }
  0x2e   : > { %3183 = shalt.err (!%p3180_p8)
}
  0x2f   : > { %s4232_s16 = smov 64   ;;  %s4234_s17 = smov 4  }
  0x30   : > { %2946 = dma.hbm_to_vmem [thread:$0]  (!%p3470_p11), %s4263_s1, 5120, %s203_s30, [#allocation7], %s4232_s16, %s4232_s16, %s4234_s17  }
  0x31   : > { %p36_p1 = scmp.ge.s32.totalorder %s34_s7, 2  ;;  %s43_s8 = sadd.s32 1, %s3354_s20 }
  0x32   : > { %p50_p2 = scmp.ne.s32.totalorder %s3354_s20, %s3350_s19  ;;  %p51_p4 = scmp.eq.s32.totalorder %s3366_s23, 0 }
  0x33   : > { %s4313_s7 = smov (%p36_p1, %s34_s7), 0  ;;  %p4265_p8 = scmp.eq.s32.totalorder %s3442_s24, 1 }
  0x34   : > { %4264 = sst [smem:[#allocation19_spill]] %s4313_s7  ;;  %p52_p6 = por %p51_p4, %p50_p2 }
  0x35   : > { %p3508_p10 = por %p4265_p8, %p50_p2  ;;  %s38_s10 = ssub.s32 %s3362_s22, %s4313_s7 }
  0x36   : > { %p2963_p12 = scmp.lt.s32.totalorder %s3366_s23, 2  ;;  %p41_p0 = scmp.eq.s32.totalorder %s38_s10, 0 }
  0x37   : > { %s4266_s9 = scalar_select %p3508_p10, 1, 0 }
  0x38   : > { %s232_s11 = sand.u32 1, %s3366_s23   ;;  %s234_s12 = sand.u32 1, %s3354_s20  }
  0x39   : > { %s3518_s30 = scalar_select %p41_p0, %s3354_s20, %s43_s8  }
  0x3a   : > { %s2923_s13 = smul.u32 400, %s234_s12  ;;  %p3520_p3 = pnand %p2963_p12, %p52_p6 }
  0x3b   : > { %4267 = sst [smem:[#allocation20_spill]] %s3518_s30  ;;  %s2964_s15 = smul.u32 6400, %s3362_s22 }
  0x3c   : > { %s4268_s14 = scalar_select %p3520_p3, 1, 0 }
  0x3d   : > { %s236_s25 = scalar_lea.vmem [#allocation3], %s2923_s13  ;;  %s4269_s0 = sld [smem:[#allocation29_spill]] }
  0x3e   : > { %s246_s29 = sshll.u32 %s236_s25, 4  ;;  %s3532_s8 = smul.u32 160, %s234_s12  ;;  %s3530_s29 = int_to_ptr.vmem [resolvable:$true] %s246_s29 }
  0x3f   : > { %s3534_s10 = scalar_lea.sflag [#allocation4], %s232_s11  ;;  %p4243_p7 = pneg %p3520_p3 }
  0x43   : > { %s3528_s1 = scalar_lea.hbm %s4269_s0, %s2964_s15  ;;  %s3189_s13 = scalar_lea.hbm %s4269_s0, 12800 }
  0x44   : > { %s3184_s7 = scalar_lea.hbm %s3528_s1, 6400  ;;  %p3190_p2 = scmp.lt.u32.totalorder %s3528_s1, %s4269_s0 }
  0x45   : > { %p3185_p5 = scmp.ne.s32.totalorder %s3528_s1, %s3184_s7  ;;  %p3191_p4 = scmp.lt.u32.totalorder %s3189_s13, %s3184_s7 }
  0x46   : > { %p3193_p8 = scmp.lt.u32.totalorder %s3184_s7, %s3528_s1 }
  0x47   : > { %p3187_p9 = pnand %p4243_p7, %p3185_p5  ;;  %p3192_p6 = por %p3191_p4, %p3190_p2 }
  0x49   : > { %p3188_p1 = pneg %p3187_p9  ;;  %p3194_p12 = por %p3193_p8, %p3192_p6 }
  0x4b   : > { %p3195_p0 = pnand %p3194_p12, %p3188_p1 }
  0x4d   : > { %3198 = shalt.err (!%p3195_p0)
}
  0x4e   : > { %s3199_s11 = scalar_lea.vmem %s3530_s29, 6400  ;;  %s3371_s12 = smov [#allocation3]  }
  0x4f   : > { %p3200_p5 = scmp.ne.s32.totalorder %s3530_s29, %s3199_s11  ;;  %s3204_s16 = sshll.u32 %s3371_s12, 4  ;;  %s3205_s16 = int_to_ptr.vmem [resolvable:$false] %s3204_s16 }
  0x50   : > { %s3206_s17 = scalar_lea.vmem %s3205_s16, 12800  ;;  %p3207_p10 = scmp.lt.s32.totalorder %s3530_s29, %s3205_s16 }
  0x51   : > { %p3202_p9 = pnand %p3200_p5, %p4243_p7  ;;  %p3208_p2 = scmp.lt.s32.totalorder %s3206_s17, %s3199_s11 }
  0x53   : > { %p3203_p13 = pneg %p3202_p9  ;;  %p3209_p4 = por %p3208_p2, %p3207_p10 }
  0x55   : > { %p3210_p6 = pnand %p3209_p4, %p3203_p13 }
  0x57   : > { %3213 = shalt.err (!%p3210_p6)
}
  0x58   : > { %s3372_s7 = smov 640   ;;  %s3373_s13 = smov 40  }
  0x59   : > { %2953 = dma.hbm_to_vmem [thread:$0]  (!%p3520_p3), %s3528_s1, 6400, %s3530_s29, %s3534_s10, %s3372_s7, %s3372_s7, %s3373_s13  }
  0x5a   : > { %s3374_s15 = smov [#allocation9]   ;;  %s2562_s12 = smul.u32 2560, %s3362_s22 }
  0x5b   : > { %s215_s25 = sshll.u32 %s3374_s15, 4  ;;  %s260_s16 = scalar_lea.vmem [#allocation8], %s3532_s8  ;;  %s216_s25 = int_to_ptr.vmem [resolvable:$true] %s215_s25 }
  0x5c   : > { %s267_s11 = sshll.u32 %s260_s16, 4  ;;  %s3214_s30 = scalar_lea.hbm %s4226_s3, 1024  ;;  %s3592_s11 = int_to_ptr.vmem [resolvable:$true] %s267_s11 }
  0x5d   : > { %p3215_p13 = scmp.ne.s32.totalorder %s4226_s3, %s3214_s30  ;;  %p4270_p10 = pneg %p3470_p11 }
  0x5e   : > { %p3221_p12 = scmp.lt.u32.totalorder %s3214_s30, %s4226_s3 }
  0x5f   : > { %p3217_p1 = pnand %p3215_p13, %p4270_p10 }
  0x61   : > { %p3218_p8 = pneg %p3217_p1 }
  0x63   : > { %p3223_p0 = pnand %p3221_p12, %p3218_p8 }
  0x65   : > { %3226 = shalt.err (!%p3223_p0)
}
  0x66   : > { %s3227_s29 = scalar_lea.vmem %s216_s25, 1024  ;;  %p4271_p9 = pmov %p4270_p10 }
  0x67   : > { %p3228_p5 = scmp.ne.s32.totalorder %s216_s25, %s3227_s29  ;;  %p3235_p6 = scmp.lt.s32.totalorder %s216_s25, %s216_s25 }
  0x68   : > { %p3236_p7 = scmp.lt.s32.totalorder %s3227_s29, %s3227_s29 }
  0x69   : > { %p3230_p2 = pnand %p3228_p5, %p4271_p9 }
  0x6a   : > { %p3237_p3 = por %p3236_p7, %p3235_p6 }
  0x6b   : > { %p3231_p4 = pneg %p3230_p2 }
  0x6d   : > { %p3238_p10 = pnand %p3237_p3, %p3231_p4 }
  0x6f   : > { %3241 = shalt.err (!%p3238_p10)
}
  0x70   : > { %s4272_s0 = smov 4   ;;  %s4273_s20 = smov 64  }
  0x71   : > { %2949 = dma.hbm_to_vmem [thread:$0]  (!%p3470_p11), %s4226_s3, 1024, %s216_s25, [#allocation7], %s4273_s20, %s4273_s20, %s4272_s0  }
  0x72   : > { %s3590_s7 = scalar_lea.hbm %s4225_s2, %s2562_s12  ;;  %p4274_p7 = scmp.ne.s32.totalorder %s4268_s14, 0 }
  0x73   : > { %s3242_s6 = scalar_lea.hbm %s3590_s7, 2560  ;;  %s3247_s25 = scalar_lea.hbm %s4225_s2, 5120 }
  0x74   : > { %p3243_p3 = scmp.ne.s32.totalorder %s3590_s7, %s3242_s6  ;;  %p4275_p13 = pneg %p4274_p7 }
  0x75   : > { %p3248_p11 = scmp.lt.u32.totalorder %s3590_s7, %s4225_s2  ;;  %p3249_p12 = scmp.lt.u32.totalorder %s3247_s25, %s3242_s6 }
  0x76   : > { %p3245_p1 = pnand %p3243_p3, %p4275_p13  ;;  %p3251_p5 = scmp.lt.u32.totalorder %s3242_s6, %s3590_s7 }
  0x77   : > { %p3250_p0 = por %p3249_p12, %p3248_p11 }
  0x78   : > { %p3246_p8 = pneg %p3245_p1 }
  0x79   : > { %p3252_p9 = por %p3251_p5, %p3250_p0 }
  0x7b   : > { %p3253_p2 = pnand %p3252_p9, %p3246_p8 }
  0x7d   : > { %3256 = shalt.err (!%p3253_p2)
}
  0x7e   : > { %s3257_s12 = scalar_lea.vmem %s3592_s11, 2560  ;;  %p4276_p6 = pmov %p4275_p13 }
  0x7f   : > { %p3258_p4 = scmp.ne.s32.totalorder %s3592_s11, %s3257_s12  ;;  %s3375_s1 = smov [#allocation8]  }
  0x80   : > { %s3262_s29 = sshll.u32 %s3375_s1, 4  ;;  %s3263_s29 = int_to_ptr.vmem [resolvable:$false] %s3262_s29 }
  0x81   : > { %p3260_p10 = pnand %p3258_p4, %p4276_p6  ;;  %s3264_s23 = scalar_lea.vmem %s3263_s29, 5120 }
  0x82   : > { %p3265_p13 = scmp.lt.s32.totalorder %s3592_s11, %s3263_s29  ;;  %p3266_p1 = scmp.lt.s32.totalorder %s3264_s23, %s3257_s12 }
  0x83   : > { %p3261_p3 = pneg %p3260_p10 }
  0x84   : > { %p3267_p11 = por %p3266_p1, %p3265_p13 }
  0x86   : > { %p3268_p12 = pnand %p3267_p11, %p3261_p3 }
  0x88   : > { %3271 = shalt.err (!%p3268_p12)
}
  0x89   : > { %2956 = dma.hbm_to_vmem [thread:$0]  (!%p4274_p7), %s3590_s7, 2560, %s3592_s11, %s3534_s10, %s4273_s20, %s4273_s20, %s4272_s0  }
  0x8a   : > { %p4277_p8 = scmp.ne.s32.totalorder %s4261_s28, 0 }
  0x8c   : > { %279 = sbr.rel (%p4277_p8) target bundleno = 1054 (0x41e), region = 40 }
  0x93   : > { %s281_s27 = sand.u32 1, %s3442_s24   ;;  %s3625_s30 = sand.u32 1, %s3350_s19  }
  0x94   : > { %s2926_s8 = smul.u32 400, %s3625_s30  ;;  %s282_s6 = scalar_lea.sflag [#allocation4], %s281_s27 }
  0x95   : > { %p4278_p0 = scmp.ne.s32.totalorder %s4258_s26, 0 }
  0x96   : > { %s3628_s14 = scalar_lea.vmem [#allocation3], %s2926_s8 }
  0x97   : > { %3325 = dma.done.wait (%p4278_p0), %s282_s6, 6400  }
  0x98   : > { %3327 = vsyncadd (%p4278_p0), %s282_s6, 4294960896  ;;  %p4279_p7 = scmp.eq.s32.totalorder %s3442_s24, 0 }
  0x9a   : > { %3329 = dma.done.wait (%p4279_p7), [#allocation7], 5120   ;;  %p4280_p5 = pmov %p4279_p7 }
  0x9b   : > { %s2927_s28 = smul.u32 160, %s3625_s30 }
  0x9c   : > { %3331 = vsyncadd (%p4280_p5), [#allocation7], 4294962176 }
  0x9d   : > { %s3639_s10 = scalar_lea.vmem [#allocation8], %s2927_s28 }
  0x9e   : > { %3333 = dma.done.wait (%p4278_p0), %s282_s6, 2560  }
  0x9f   : > { %3335 = vsyncadd (%p4278_p0), %s282_s6, 4294964736  ;;  %p4281_p9 = pmov %p4280_p5 }
  0xa0   : > { %p4282_p2 = pmov %p4280_p5 }
  0xa1   : > { %3337 = dma.done.wait (%p4281_p9), [#allocation7], 1024  }
  0xa2   : > { %3339 = vsyncadd (%p4282_p2), [#allocation7], 4294966272  ;;  %v3376_v0 = vmov 0   ;;  %v3028_v1 = vld [vmem:[#allocation6] sm:$0xff]   ;;  %v3029_v2 = vld [vmem:[#allocation6 + $0x8] sm:$0xff]   ;;  %s2928_s24 = smul.u32 320, %s3625_s30 }
  0xa3   : > { %894 = vmatprep.subr.bf16.mxu0 %v3376_v0  ;;  %2831 = vmatprep.subr.bf16.mxu1 %v3376_v0  ;;  %v3030_v3 = vld [vmem:[#allocation6 + $0x10] sm:$0xff]   ;;  %v3031_v4 = vld [vmem:[#allocation6 + $0x18] sm:$0xff]   ;;  %v3032_v5 = vld [vmem:[#allocation6 + $0x20] sm:$0xff]   ;;  %s2563_s20 = smul.u32 5120, %s3358_s21  ;;  %s2361_s21 = scalar_lea.sflag [#allocation5], %s3625_s30 }
  0xa4   : > { %895 = vmatpush1.bf16.msra.mxu0 %v3028_v1  ;;  %2847 = vmatpush1.bf16.msra.mxu1 %v3028_v1  ;;  %v3660_v6 = vld [vmem:[%s3628_s14 + $0x8] sm:$0xff]  ;;  %v3663_v7 = vld [vmem:[%s3628_s14 + $0xd0] sm:$0xff]  ;;  %v384_v21 = vld [vmem:[%s3628_s14] sm:$0xff]  ;;  %s4087_s0 = scalar_lea.vmem [#allocation10], %s2928_s24  ;;  %p4299_p6 = scmp.ne.s32.totalorder %s4266_s9, 0 }
  0xa5   : > { %896 = vmatprep.subr.bf16.mxu0 %v3376_v0  ;;  %2832 = vmatprep.subr.bf16.mxu1 %v3376_v0  ;;  %v435_v8 = vunpack.c.l.s8.bf16 %v3660_v6  ;;  %v485_v9 = vunpack.c.l.s8.bf16 %v3663_v7  ;;  %v3033_v10 = vld [vmem:[#allocation6 + $0x28] sm:$0xff]   ;;  %v3034_v11 = vld [vmem:[#allocation6 + $0x30] sm:$0xff]   ;;  %v3035_v12 = vld [vmem:[#allocation6 + $0x38] sm:$0xff]   ;;  %v434_v24 = vunpack.c.l.s8.bf16 %v384_v21  ;;  %v440_v26 = vunpack.c.h.s8.bf16 %v3660_v6  ;;  %s2374_s7 = sshll.u32 %s4087_s0, 4  ;;  %s4168_s25 = scalar_lea.hbm %s4228_s5, %s2563_s20  ;;  %s4170_s7 = int_to_ptr.vmem [resolvable:$true] %s2374_s7 }
  0xa6   : > { %v3036_v13 = vld [vmem:[#allocation6 + $0x40] sm:$0xff]   ;;  %v3037_v14 = vld [vmem:[#allocation6 + $0x48] sm:$0xff]   ;;  %v3038_v15 = vld [vmem:[#allocation6 + $0x50] sm:$0xff]   ;;  %v490_v28 = vunpack.c.h.s8.bf16 %v3663_v7  ;;  %v439_v33 = vunpack.c.h.s8.bf16 %v384_v21  ;;  %s3272_s16 = scalar_lea.vmem %s4170_s7, 5120  ;;  %s3378_s17 = smov [#allocation10]  }
  0xa7   : > { %926 = vmatprep.mubr.bf16.mxu0 %v435_v8  ;;  %1006 = vmatprep.mubr.bf16.mxu1 %v485_v9  ;;  %v3039_v16 = vld [vmem:[#allocation6 + $0x58] sm:$0xff]   ;;  %v3040_v17 = vld [vmem:[#allocation6 + $0x60] sm:$0xff]   ;;  %v3041_v18 = vld [vmem:[#allocation6 + $0x68] sm:$0xff]   ;;  %p3273_p4 = scmp.ne.s32.totalorder %s4170_s7, %s3272_s16  ;;  %s3276_s12 = sshll.u32 %s3378_s17, 4  ;;  %s3277_s12 = int_to_ptr.vmem [resolvable:$false] %s3276_s12 }
  0xa8   : > { %897 = vmatpush1.bf16.msra.mxu0 %v3029_v2  ;;  %2848 = vmatpush1.bf16.msra.mxu1 %v3029_v2  ;;  %v3042_v19 = vld [vmem:[#allocation6 + $0x70] sm:$0xff]   ;;  %v3043_v20 = vld [vmem:[#allocation6 + $0x78] sm:$0xff]   ;;  %v3054_v23 = vld [vmem:[#allocation6 + $0x100] sm:$0xff]   ;;  %s3278_s1 = scalar_lea.vmem %s3277_s12, 10240  ;;  %p3279_p13 = scmp.lt.s32.totalorder %s4170_s7, %s3277_s12 }
  0xa9   : > { %898 = vmatprep.subr.bf16.mxu0 %v3376_v0  ;;  %2833 = vmatprep.subr.bf16.mxu1 %v3376_v0  ;;  %v409_v22 = vld [vmem:[%s3628_s14 + $0xc8] sm:$0xff]  ;;  %v3044_v27 = vld [vmem:[#allocation6 + $0x80] sm:$0xff]   ;;  %v415_v32 = vld [vmem:[%s3628_s14 + $0xf8] sm:$0xff]  ;;  %p3274_p10 = pnand %p3273_p4, %p4299_p6  ;;  %p3280_p1 = scmp.lt.s32.totalorder %s3278_s1, %s3272_s16 }
  0xaa   : > { %v484_v25 = vunpack.c.l.s8.bf16 %v409_v22  ;;  %v3056_v29 = vld [vmem:[#allocation6 + $0x108] sm:$0xff]   ;;  %v390_v31 = vld [vmem:[%s3628_s14 + $0x30] sm:$0xff]  ;;  %v489_v34 = vunpack.c.h.s8.bf16 %v409_v22  ;;  %v495_v37 = vunpack.c.l.s8.bf16 %v415_v32  ;;  %v3047_v41 = vld [vmem:[#allocation6 + $0x98] sm:$0xff]   ;;  %v500_v47 = vunpack.c.h.s8.bf16 %v415_v32 }
  0xab   : > { %v3045_v30 = vld [vmem:[#allocation6 + $0x88] sm:$0xff]   ;;  %v3046_v35 = vld [vmem:[#allocation6 + $0x90] sm:$0xff]   ;;  %v445_v36 = vunpack.c.l.s8.bf16 %v390_v31  ;;  %v3059_v42 = vld [vmem:[#allocation6 + $0x118] sm:$0xff]   ;;  %v450_v46 = vunpack.c.h.s8.bf16 %v390_v31  ;;  %p3275_p3 = pneg %p3274_p10  ;;  %p3281_p11 = por %p3280_p1, %p3279_p13 }
  0xac   : > { %899 = vmatpush1.bf16.msra.mxu0 %v3030_v3  ;;  %2849 = vmatpush1.bf16.msra.mxu1 %v3030_v3  ;;  %v3058_v38 = vld [vmem:[#allocation6 + $0x110] sm:$0xff]   ;;  %v389_v39 = vld [vmem:[%s3628_s14 + $0x28] sm:$0xff]  ;;  %v3048_v45 = vld [vmem:[#allocation6 + $0xa0] sm:$0xff]  }
  0xad   : > { %900 = vmatprep.subr.bf16.mxu0 %v3376_v0  ;;  %2834 = vmatprep.subr.bf16.mxu1 %v3376_v0  ;;  %v414_v40 = vld [vmem:[%s3628_s14 + $0xf0] sm:$0xff]  ;;  %v444_v43 = vunpack.c.l.s8.bf16 %v389_v39  ;;  %v3049_v49 = vld [vmem:[#allocation6 + $0xa8] sm:$0xff]   ;;  %v420_v51 = vld [vmem:[%s3628_s14 + $0x120] sm:$0xff]  ;;  %v449_v52 = vunpack.c.h.s8.bf16 %v389_v39  ;;  %p3282_p12 = pnand %p3281_p11, %p3275_p3 }
  0xae   : > { %v494_v44 = vunpack.c.l.s8.bf16 %v414_v40  ;;  %v3061_v48 = vld [vmem:[#allocation6 + $0x120] sm:$0xff]   ;;  %v395_v50 = vld [vmem:[%s3628_s14 + $0x58] sm:$0xff]  ;;  %v499_v53 = vunpack.c.h.s8.bf16 %v414_v40  ;;  %v505_v55 = vunpack.c.l.s8.bf16 %v420_v51  ;;  %v3050_v56 = vld [vmem:[#allocation6 + $0xb0] sm:$0xff]   ;;  %v510_v2 = vunpack.c.h.s8.bf16 %v420_v51 }
  0xaf   : > { %v455_v54 = vunpack.c.l.s8.bf16 %v395_v50  ;;  %v3063_v57 = vld [vmem:[#allocation6 + $0x128] sm:$0xff]   ;;  %v3065_v58 = vld [vmem:[#allocation6 + $0x130] sm:$0xff]   ;;  %v3051_v61 = vld [vmem:[#allocation6 + $0xb8] sm:$0xff]   ;;  %v460_v1 = vunpack.c.h.s8.bf16 %v395_v50 }
  0xb0   : > { %901 = vmatpush1.bf16.msra.mxu0 %v3031_v4  ;;  %2850 = vmatpush1.bf16.msra.mxu1 %v3031_v4  ;;  %v394_v59 = vld [vmem:[%s3628_s14 + $0x50] sm:$0xff]  ;;  %v419_v60 = vld [vmem:[%s3628_s14 + $0x118] sm:$0xff]  ;;  %v400_v6 = vld [vmem:[%s3628_s14 + $0x80] sm:$0xff] }
  0xb1   : > { %902 = vmatprep.subr.bf16.mxu0 %v3376_v0  ;;  %2835 = vmatprep.subr.bf16.mxu1 %v3376_v0  ;;  %v454_v62 = vunpack.c.l.s8.bf16 %v394_v59  ;;  %v504_v63 = vunpack.c.l.s8.bf16 %v419_v60  ;;  %v3052_v3 = vld [vmem:[#allocation6 + $0xc0] sm:$0xff]   ;;  %v3067_v4 = vld [vmem:[#allocation6 + $0x138] sm:$0xff]   ;;  %v459_v8 = vunpack.c.h.s8.bf16 %v394_v59  ;;  %v509_v9 = vunpack.c.h.s8.bf16 %v419_v60 }
  0xb2   : > { %v425_v7 = vld [vmem:[%s3628_s14 + $0x148] sm:$0xff]  ;;  %v430_v22 = vld [vmem:[%s3628_s14 + $0x170] sm:$0xff]  ;;  %v408_v60 = vld [vmem:[%s3628_s14 + $0xc0] sm:$0xff] }
  0xb3   : > { %v405_v21 = vld [vmem:[%s3628_s14 + $0xa8] sm:$0xff] }
  0xb4   : > { %903 = vmatpush1.bf16.msra.mxu0 %v3032_v5  ;;  %2851 = vmatpush1.bf16.msra.mxu1 %v3032_v5  ;;  %v3053_v5 = vld [vmem:[#allocation6 + $0xc8] sm:$0xff]   ;;  %v3066_v31 = vld [vmem:[#allocation6 + $0xf8] sm:$0xff]  }
  0xb5   : > { %904 = vmatprep.subr.bf16.mxu0 %v3376_v0  ;;  %2836 = vmatprep.subr.bf16.mxu1 %v3376_v0  ;;  %v397_v59 = vld [vmem:[%s3628_s14 + $0x68] sm:$0xff] }
  0xb8   : > { %905 = vmatpush1.bf16.msra.mxu0 %v3033_v10  ;;  %2852 = vmatpush1.bf16.msra.mxu1 %v3033_v10  ;;  %v465_v10 = vunpack.c.l.s8.bf16 %v400_v6 }
  0xb9   : > { %906 = vmatprep.subr.bf16.mxu0 %v3376_v0  ;;  %2837 = vmatprep.subr.bf16.mxu1 %v3376_v0 }
  0xbc   : > { %907 = vmatpush1.bf16.msra.mxu0 %v3034_v11  ;;  %2853 = vmatpush1.bf16.msra.mxu1 %v3034_v11  ;;  %v515_v11 = vunpack.c.l.s8.bf16 %v425_v7 }
  0xbd   : > { %908 = vmatprep.subr.bf16.mxu0 %v3376_v0  ;;  %2838 = vmatprep.subr.bf16.mxu1 %v3376_v0 }
  0xc0   : > { %909 = vmatpush1.bf16.msra.mxu0 %v3035_v12  ;;  %2854 = vmatpush1.bf16.msra.mxu1 %v3035_v12  ;;  %v3055_v12 = vld [vmem:[#allocation6 + $0xd0] sm:$0xff]  }
  0xc1   : > { %910 = vmatprep.subr.bf16.mxu0 %v3376_v0  ;;  %2839 = vmatprep.subr.bf16.mxu1 %v3376_v0 }
  0xc4   : > { %911 = vmatpush1.bf16.msra.mxu0 %v3036_v13  ;;  %2855 = vmatpush1.bf16.msra.mxu1 %v3036_v13  ;;  %v399_v13 = vld [vmem:[%s3628_s14 + $0x78] sm:$0xff] }
  0xc5   : > { %912 = vmatprep.subr.bf16.mxu0 %v3376_v0  ;;  %2840 = vmatprep.subr.bf16.mxu1 %v3376_v0 }
  0xc8   : > { %913 = vmatpush1.bf16.msra.mxu0 %v3037_v14  ;;  %2856 = vmatpush1.bf16.msra.mxu1 %v3037_v14  ;;  %v424_v14 = vld [vmem:[%s3628_s14 + $0x140] sm:$0xff] }
  0xc9   : > { %914 = vmatprep.subr.bf16.mxu0 %v3376_v0  ;;  %2841 = vmatprep.subr.bf16.mxu1 %v3376_v0 }
  0xcc   : > { %915 = vmatpush1.bf16.msra.mxu0 %v3038_v15  ;;  %2857 = vmatpush1.bf16.msra.mxu1 %v3038_v15  ;;  %v3057_v15 = vld [vmem:[#allocation6 + $0xd8] sm:$0xff]  }
  0xcd   : > { %916 = vmatprep.subr.bf16.mxu0 %v3376_v0  ;;  %2842 = vmatprep.subr.bf16.mxu1 %v3376_v0 }
  0xd0   : > { %917 = vmatpush1.bf16.msra.mxu0 %v3039_v16  ;;  %2858 = vmatpush1.bf16.msra.mxu1 %v3039_v16  ;;  %v464_v16 = vunpack.c.l.s8.bf16 %v399_v13 }
  0xd1   : > { %918 = vmatprep.subr.bf16.mxu0 %v3376_v0  ;;  %2843 = vmatprep.subr.bf16.mxu1 %v3376_v0 }
  0xd4   : > { %919 = vmatpush1.bf16.msra.mxu0 %v3040_v17  ;;  %2859 = vmatpush1.bf16.msra.mxu1 %v3040_v17  ;;  %v514_v17 = vunpack.c.l.s8.bf16 %v424_v14 }
  0xd5   : > { %920 = vmatprep.subr.bf16.mxu0 %v3376_v0  ;;  %2844 = vmatprep.subr.bf16.mxu1 %v3376_v0 }
  0xd8   : > { %921 = vmatpush1.bf16.msra.mxu0 %v3041_v18  ;;  %2860 = vmatpush1.bf16.msra.mxu1 %v3041_v18  ;;  %v470_v18 = vunpack.c.h.s8.bf16 %v400_v6  ;;  %v462_v6 = vunpack.c.h.s8.bf16 %v397_v59 }
  0xd9   : > { %922 = vmatprep.subr.bf16.mxu0 %v3376_v0  ;;  %2845 = vmatprep.subr.bf16.mxu1 %v3376_v0 }
  0xdc   : > { %923 = vmatpush1.bf16.msra.mxu0 %v3042_v19  ;;  %2861 = vmatpush1.bf16.msra.mxu1 %v3042_v19  ;;  %v520_v19 = vunpack.c.h.s8.bf16 %v425_v7 }
  0xdd   : > { %924 = vmatprep.subr.bf16.mxu0 %v3376_v0  ;;  %2846 = vmatprep.subr.bf16.mxu1 %v3376_v0 }
  0xe0   : > { %925 = vmatpush1.bf16.msra.mxu0 %v3043_v20  ;;  %2862 = vmatpush1.bf16.msra.mxu1 %v3043_v20  ;;  %v3060_v20 = vld [vmem:[#allocation6 + $0xe0] sm:$0xff]  }
  0xe1   : > { %1087 = vmatprep.subr.bf16.mxu0 %v3376_v0  ;;  %2719 = vmatprep.subr.bf16.mxu1 %v3054_v23 }
  0xe3   : > { %927 = vmatmul.mubr.bf16.vlgmr.msra.gmra.mrb[0].mxu0 %v434_v24  ;;  %1007 = vmatmul.mubr.bf16.vlgmr.msra.gmra.mrb[0].mxu1 %v484_v25  ;;  %v469_v24 = vunpack.c.h.s8.bf16 %v399_v13  ;;  %v519_v25 = vunpack.c.h.s8.bf16 %v424_v14  ;;  %v401_v14 = vld [vmem:[%s3628_s14 + $0x88] sm:$0xff] }
  0xe4   : > { %1088 = vmatpush1.bf16.msra.mxu0 %v3044_v27  ;;  %934 = vmatprep.mubr.bf16.mxu0 %v440_v26  ;;  %v475_v26 = vunpack.c.l.s8.bf16 %v405_v21  ;;  %v525_v27 = vunpack.c.l.s8.bf16 %v430_v22 }
  0xe5   : > { %1089 = vmatprep.subr.bf16.mxu0 %v3376_v0  ;;  %1014 = vmatprep.mubr.bf16.mxu1 %v490_v28  ;;  %v3064_v28 = vld [vmem:[#allocation6 + $0xf0] sm:$0xff]  }
  0xe6   : > { %2720 = vmatpush3.bf16.msra.mxu1 %v3054_v23  ;;  %v3062_v23 = vld [vmem:[#allocation6 + $0xe8] sm:$0xff]  }
  0xe7   : > { %2721 = vmatprep.subr.bf16.mxu1 %v3056_v29 }
  0xe8   : > { %1090 = vmatpush1.bf16.msra.mxu0 %v3045_v30  ;;  %v429_v30 = vld [vmem:[%s3628_s14 + $0x168] sm:$0xff] }
  0xe9   : > { %1091 = vmatprep.subr.bf16.mxu0 %v3376_v0  ;;  %v529_v39 = vunpack.c.h.s8.bf16 %v429_v30 }
  0xea   : > { %2722 = vmatpush3.bf16.msra.mxu1 %v3056_v29  ;;  %v404_v29 = vld [vmem:[%s3628_s14 + $0xa0] sm:$0xff] }
  0xeb   : > { %935 = vmatmul.mubr.bf16.gmra.mrb[4].mxu0 %v439_v33  ;;  %1015 = vmatmul.mubr.bf16.gmra.mrb[4].mxu1 %v489_v34  ;;  %v474_v32 = vunpack.c.l.s8.bf16 %v404_v29  ;;  %v524_v33 = vunpack.c.l.s8.bf16 %v429_v30  ;;  %v480_v34 = vunpack.c.h.s8.bf16 %v405_v21  ;;  %v428_v21 = vld [vmem:[%s3628_s14 + $0x160] sm:$0xff] }
  0xec   : > { %1092 = vmatpush1.bf16.msra.mxu0 %v3046_v35  ;;  %942 = vmatprep.mubr.bf16.mxu0 %v445_v36  ;;  %v530_v35 = vunpack.c.h.s8.bf16 %v430_v22  ;;  %v387_v36 = vld [vmem:[%s3628_s14 + $0x18] sm:$0xff]  ;;  %v471_v22 = vunpack.c.h.s8.bf16 %v401_v14 }
  0xed   : > { %1022 = vmatprep.mubr.bf16.mxu1 %v495_v37  ;;  %1093 = vmatprep.subr.bf16.mxu0 %v3376_v0  ;;  %v388_v37 = vld [vmem:[%s3628_s14 + $0x20] sm:$0xff]  ;;  %v437_v40 = vunpack.c.l.s8.bf16 %v387_v36 }
  0xee   : > { %2723 = vmatprep.subr.bf16.mxu1 %v3058_v38 }
  0xef   : > { %2724 = vmatpush3.bf16.msra.mxu1 %v3058_v38  ;;  %v479_v38 = vunpack.c.h.s8.bf16 %v404_v29  ;;  %v523_v29 = vunpack.c.h.s8.bf16 %v428_v21 }
  0xf0   : > { %1094 = vmatpush1.bf16.msra.mxu0 %v3047_v41  ;;  %2725 = vmatprep.subr.bf16.mxu1 %v3059_v42  ;;  %v438_v41 = vunpack.c.l.s8.bf16 %v388_v37 }
  0xf1   : > { %1095 = vmatprep.subr.bf16.mxu0 %v3376_v0 }
  0xf3   : > { %943 = vmatmul.mubr.bf16.gmra.mrb[8].mxu0 %v444_v43  ;;  %1023 = vmatmul.mubr.bf16.gmra.mrb[8].mxu1 %v494_v44  ;;  %v443_v43 = vunpack.c.h.s8.bf16 %v388_v37 }
  0xf4   : > { %1096 = vmatpush1.bf16.msra.mxu0 %v3048_v45  ;;  %950 = vmatprep.mubr.bf16.mxu0 %v450_v46  ;;  %v442_v45 = vunpack.c.h.s8.bf16 %v387_v36  ;;  %v411_v36 = vld [vmem:[%s3628_s14 + $0xd8] sm:$0xff] }
  0xf5   : > { %1030 = vmatprep.mubr.bf16.mxu1 %v500_v47  ;;  %1097 = vmatprep.subr.bf16.mxu0 %v3376_v0  ;;  %v392_v47 = vld [vmem:[%s3628_s14 + $0x40] sm:$0xff]  ;;  %v486_v37 = vunpack.c.l.s8.bf16 %v411_v36 }
  0xf6   : > { %2726 = vmatpush3.bf16.msra.mxu1 %v3059_v42  ;;  %v393_v42 = vld [vmem:[%s3628_s14 + $0x48] sm:$0xff]  ;;  %v447_v51 = vunpack.c.l.s8.bf16 %v392_v47 }
  0xf7   : > { %2727 = vmatprep.subr.bf16.mxu1 %v3061_v48  ;;  %v448_v46 = vunpack.c.l.s8.bf16 %v393_v42  ;;  %v453_v50 = vunpack.c.h.s8.bf16 %v393_v42 }
  0xf8   : > { %1098 = vmatpush1.bf16.msra.mxu0 %v3049_v49 }
  0xf9   : > { %1099 = vmatprep.subr.bf16.mxu0 %v3376_v0 }
  0xfa   : > { %2728 = vmatpush3.bf16.msra.mxu1 %v3061_v48  ;;  %v398_v48 = vld [vmem:[%s3628_s14 + $0x70] sm:$0xff] }
  0xfb   : > { %951 = vmatmul.mubr.bf16.gmra.mrb[12].mxu0 %v449_v52  ;;  %1031 = vmatmul.mubr.bf16.gmra.mrb[12].mxu1 %v499_v53  ;;  %v458_v52 = vunpack.c.l.s8.bf16 %v398_v48  ;;  %v391_v53 = vld [vmem:[%s3628_s14 + $0x38] sm:$0xff] }
  0xfc   : > { %958 = vmatprep.mubr.bf16.mxu0 %v455_v54  ;;  %1038 = vmatprep.mubr.bf16.mxu1 %v505_v55  ;;  %v403_v54 = vld [vmem:[%s3628_s14 + $0x98] sm:$0xff]  ;;  %v446_v55 = vunpack.c.l.s8.bf16 %v391_v53 }
  0xfd   : > { %1100 = vmatpush1.bf16.msra.mxu0 %v3050_v56  ;;  %2729 = vmatprep.subr.bf16.mxu1 %v3063_v57  ;;  %v463_v56 = vunpack.c.h.s8.bf16 %v398_v48  ;;  %v421_v48 = vld [vmem:[%s3628_s14 + $0x128] sm:$0xff] }
  0xfe   : > { %1101 = vmatprep.subr.bf16.mxu0 %v3376_v0  ;;  %2730 = vmatpush3.bf16.msra.mxu1 %v3063_v57  ;;  %v452_v57 = vunpack.c.h.s8.bf16 %v392_v47 }
  0xff   : > { %2731 = vmatprep.subr.bf16.mxu1 %v3065_v58 }
 0x101   : > { %1102 = vmatpush1.bf16.msra.mxu0 %v3051_v61  ;;  %v451_v61 = vunpack.c.h.s8.bf16 %v391_v53 }
 0x102   : > { %1103 = vmatprep.subr.bf16.mxu0 %v3376_v0  ;;  %2732 = vmatpush3.bf16.msra.mxu1 %v3065_v58  ;;  %v468_v58 = vunpack.c.l.s8.bf16 %v403_v54 }
 0x103   : > { %959 = vmatmul.mubr.bf16.gmra.mrb[16].mxu0 %v454_v62  ;;  %1039 = vmatmul.mubr.bf16.gmra.mrb[16].mxu1 %v504_v63  ;;  %v473_v62 = vunpack.c.h.s8.bf16 %v403_v54  ;;  %v457_v63 = vunpack.c.l.s8.bf16 %v397_v59  ;;  %v426_v54 = vld [vmem:[%s3628_s14 + $0x150] sm:$0xff] }
 0x104   : > { %966 = vmatprep.mubr.bf16.mxu0 %v460_v1  ;;  %1046 = vmatprep.mubr.bf16.mxu1 %v510_v2  ;;  %v478_v1 = vunpack.c.l.s8.bf16 %v408_v60  ;;  %v396_v2 = vld [vmem:[%s3628_s14 + $0x60] sm:$0xff]  ;;  %v521_v59 = vunpack.c.h.s8.bf16 %v426_v54 }
 0x105   : > { %1104 = vmatpush1.bf16.msra.mxu0 %v3052_v3  ;;  %2733 = vmatprep.subr.bf16.mxu1 %v3067_v4  ;;  %v413_v3 = vld [vmem:[%s3628_s14 + $0xe8] sm:$0xff] }
 0x106   : > { %1105 = vmatprep.subr.bf16.mxu0 %v3376_v0  ;;  %2734 = vmatpush3.bf16.msra.mxu1 %v3067_v4  ;;  %v456_v4 = vunpack.c.l.s8.bf16 %v396_v2  ;;  %v488_v7 = vunpack.c.l.s8.bf16 %v413_v3 }
 0x109   : > { %1106 = vmatpush1.bf16.msra.mxu0 %v3053_v5  ;;  %v483_v5 = vunpack.c.h.s8.bf16 %v408_v60 }
 0x10a   : > { %1107 = vmatprep.subr.bf16.mxu0 %v3376_v0 }
 0x10b   : > { %967 = vmatmul.mubr.bf16.gmra.mrb[20].mxu0 %v459_v8  ;;  %1047 = vmatmul.mubr.bf16.gmra.mrb[20].mxu1 %v509_v9  ;;  %v402_v8 = vld [vmem:[%s3628_s14 + $0x90] sm:$0xff] }
 0x10c   : > { %974 = vmatprep.mubr.bf16.mxu0 %v465_v10  ;;  %1054 = vmatprep.mubr.bf16.mxu1 %v515_v11  ;;  %v418_v9 = vld [vmem:[%s3628_s14 + $0x110] sm:$0xff]  ;;  %v461_v10 = vunpack.c.h.s8.bf16 %v396_v2  ;;  %v493_v11 = vunpack.c.h.s8.bf16 %v413_v3 }
 0x10d   : > { %1108 = vmatpush1.bf16.msra.mxu0 %v3055_v12  ;;  %v467_v12 = vunpack.c.l.s8.bf16 %v402_v8  ;;  %v498_v13 = vunpack.c.l.s8.bf16 %v418_v9 }
 0x10e   : > { %1109 = vmatprep.subr.bf16.mxu0 %v3376_v0 }
 0x111   : > { %1110 = vmatpush1.bf16.msra.mxu0 %v3057_v15  ;;  %v423_v15 = vld [vmem:[%s3628_s14 + $0x138] sm:$0xff] }
 0x112   : > { %1111 = vmatprep.subr.bf16.mxu0 %v3376_v0 }
 0x113   : > { %975 = vmatmul.mubr.bf16.gmra.mrb[24].mxu0 %v464_v16  ;;  %1055 = vmatmul.mubr.bf16.gmra.mrb[24].mxu1 %v514_v17  ;;  %v466_v16 = vunpack.c.l.s8.bf16 %v401_v14  ;;  %v503_v17 = vunpack.c.h.s8.bf16 %v418_v9 }
 0x114   : > { %982 = vmatprep.mubr.bf16.mxu0 %v470_v18  ;;  %1062 = vmatprep.mubr.bf16.mxu1 %v520_v19  ;;  %v472_v18 = vunpack.c.h.s8.bf16 %v402_v8  ;;  %v508_v19 = vunpack.c.l.s8.bf16 %v423_v15 }
 0x115   : > { %1112 = vmatpush1.bf16.msra.mxu0 %v3060_v20  ;;  %v407_v20 = vld [vmem:[%s3628_s14 + $0xb8] sm:$0xff] }
 0x116   : > { %1113 = vmatprep.subr.bf16.mxu0 %v3376_v0  ;;  %v482_v30 = vunpack.c.h.s8.bf16 %v407_v20 }
 0x119   : > { %1114 = vmatpush1.bf16.msra.mxu0 %v3062_v23  ;;  %v513_v23 = vunpack.c.h.s8.bf16 %v423_v15 }
 0x11a   : > { %1115 = vmatprep.subr.bf16.mxu0 %v3376_v0 }
 0x11b   : > { %983 = vmatmul.mubr.bf16.gmra.mrb[28].mxu0 %v469_v24  ;;  %1063 = vmatmul.mubr.bf16.gmra.mrb[28].mxu1 %v519_v25  ;;  %v477_v24 = vunpack.c.l.s8.bf16 %v407_v20  ;;  %v518_v25 = vunpack.c.l.s8.bf16 %v428_v21 }
 0x11c   : > { %990 = vmatprep.mubr.bf16.mxu0 %v475_v26  ;;  %1070 = vmatprep.mubr.bf16.mxu1 %v525_v27  ;;  %v406_v26 = vld [vmem:[%s3628_s14 + $0xb0] sm:$0xff]  ;;  %v433_v27 = vld [vmem:[%s3628_s14 + $0x188] sm:$0xff] }
 0x11d   : > { %1116 = vmatpush1.bf16.msra.mxu0 %v3064_v28  ;;  %v476_v28 = vunpack.c.l.s8.bf16 %v406_v26 }
 0x11e   : > { %1117 = vmatprep.subr.bf16.mxu0 %v3376_v0  ;;  %v386_v0 = vld [vmem:[%s3628_s14 + $0x10] sm:$0xff] }
 0x11f   : > { %v436_v44 = vunpack.c.l.s8.bf16 %v386_v0  ;;  %v441_v49 = vunpack.c.h.s8.bf16 %v386_v0  ;;  %v416_v0 = vld [vmem:[%s3628_s14 + $0x100] sm:$0xff] }
 0x120   : > { %v496_v42 = vunpack.c.l.s8.bf16 %v416_v0 }
 0x121   : > { %1118 = vmatpush1.bf16.msra.mxu0 %v3066_v31  ;;  %v528_v31 = vunpack.c.l.s8.bf16 %v433_v27 }
 0x123   : > { %991 = vmatmul.mubr.bf16.gmra.mrb[32].mxu0 %v474_v32  ;;  %1071 = vmatmul.mubr.bf16.gmra.mrb[32].mxu1 %v524_v33  ;;  %v412_v32 = vld [vmem:[%s3628_s14 + $0xe0] sm:$0xff]  ;;  %v481_v33 = vunpack.c.h.s8.bf16 %v406_v26 }
 0x124   : > { %998 = vmatprep.mubr.bf16.mxu0 %v480_v34  ;;  %1078 = vmatprep.mubr.bf16.mxu1 %v530_v35  ;;  %v533_v34 = vunpack.c.h.s8.bf16 %v433_v27  ;;  %v487_v35 = vunpack.c.l.s8.bf16 %v412_v32 }
 0x12b   : > { %999 = vmatmul.mubr.bf16.gmra.mrb[36].mxu0 %v479_v38  ;;  %1079 = vmatmul.mubr.bf16.gmra.mrb[36].mxu1 %v529_v39  ;;  %v492_v38 = vunpack.c.h.s8.bf16 %v412_v32  ;;  %v417_v39 = vld [vmem:[%s3628_s14 + $0x108] sm:$0xff] }
 0x12c   : > { %1119 = vmatprep.mubr.bf16.mxu0 %v437_v40  ;;  %2735 = vmatprep.mubr.bf16.mxu1 %v438_v41  ;;  %v491_v40 = vunpack.c.h.s8.bf16 %v411_v36  ;;  %v497_v41 = vunpack.c.l.s8.bf16 %v417_v39 }
 0x133   : > { %1120 = vmatmul.mubr.bf16.vlgmr.msra.gmra.mrb[0].mxu0 %v436_v44  ;;  %2736 = vmatmul.mubr.bf16.vlgmr.msra.gmra.mrb[40].mxu1 %v443_v43  ;;  %v502_v43 = vunpack.c.h.s8.bf16 %v417_v39  ;;  %v422_v44 = vld [vmem:[%s3628_s14 + $0x130] sm:$0xff] }
 0x134   : > { %1127 = vmatprep.mubr.bf16.mxu0 %v442_v45  ;;  %2739 = vmatprep.mubr.bf16.mxu1 %v448_v46  ;;  %v3377_v45 = vmov 96   ;;  %v501_v46 = vunpack.c.h.s8.bf16 %v416_v0  ;;  %v507_v47 = vunpack.c.l.s8.bf16 %v422_v44 }
 0x135   : > { %3026 = vset.pattern.permute.xlu0 %v3377_v45  ;;  %3027 = vset.pattern.permute.xlu1 %v3377_v45 }
 0x13b   : > { %1128 = vmatmul.mubr.bf16.gmra.mrb[4].mxu0 %v441_v49  ;;  %2740 = vmatmul.mubr.bf16.gmra.mrb[44].mxu1 %v453_v50  ;;  %v506_v49 = vunpack.c.l.s8.bf16 %v421_v48  ;;  %v512_v50 = vunpack.c.h.s8.bf16 %v422_v44 }
 0x13c   : > { %1135 = vmatprep.mubr.bf16.mxu0 %v447_v51  ;;  %2743 = vmatprep.mubr.bf16.mxu1 %v458_v52  ;;  %v427_v51 = vld [vmem:[%s3628_s14 + $0x158] sm:$0xff]  ;;  %v511_v52 = vunpack.c.h.s8.bf16 %v421_v48 }
 0x13d   : > { %v517_v53 = vunpack.c.l.s8.bf16 %v427_v51  ;;  %v3069_v48 = vld [vmem:[#allocation9 + $0x8] sm:$0xff]  }
 0x143   : > { %1136 = vmatmul.mubr.bf16.gmra.mrb[8].mxu0 %v446_v55  ;;  %2744 = vmatmul.mubr.bf16.gmra.mrb[48].mxu1 %v463_v56  ;;  %v516_v55 = vunpack.c.l.s8.bf16 %v426_v54  ;;  %v522_v56 = vunpack.c.h.s8.bf16 %v427_v51  ;;  %v3070_v54 = vld [vmem:[#allocation9 + $0x10] sm:$0xff]  }
 0x144   : > { %1143 = vmatprep.mubr.bf16.mxu0 %v452_v57  ;;  %2747 = vmatprep.mubr.bf16.mxu1 %v468_v58  ;;  %v432_v57 = vld [vmem:[%s3628_s14 + $0x180] sm:$0xff] }
 0x14b   : > { %1144 = vmatmul.mubr.bf16.gmra.mrb[12].mxu0 %v451_v61  ;;  %2748 = vmatmul.mubr.bf16.gmra.mrb[52].mxu1 %v473_v62  ;;  %v527_v61 = vunpack.c.l.s8.bf16 %v432_v57 }
 0x14c   : > { %1151 = vmatprep.mubr.bf16.mxu0 %v457_v63  ;;  %2751 = vmatprep.mubr.bf16.mxu1 %v478_v1  ;;  %v431_v1 = vld [vmem:[%s3628_s14 + $0x178] sm:$0xff] }
 0x14d   : > { %v526_v3 = vunpack.c.l.s8.bf16 %v431_v1  ;;  %v531_v9 = vunpack.c.h.s8.bf16 %v431_v1  ;;  %v3071_v1 = vld [vmem:[#allocation9 + $0x18] sm:$0xff]  }
 0x153   : > { %1152 = vmatmul.mubr.bf16.gmra.mrb[16].mxu0 %v456_v4  ;;  %2752 = vmatmul.mubr.bf16.gmra.mrb[56].mxu1 %v483_v5  ;;  %v532_v5 = vunpack.c.h.s8.bf16 %v432_v57 }
 0x154   : > { %1159 = vmatprep.mubr.bf16.mxu0 %v462_v6  ;;  %2755 = vmatprep.mubr.bf16.mxu1 %v488_v7 }
 0x15b   : > { %1160 = vmatmul.mubr.bf16.gmra.mrb[20].mxu0 %v461_v10  ;;  %2756 = vmatmul.mubr.bf16.gmra.mrb[60].mxu1 %v493_v11 }
 0x15c   : > { %1167 = vmatprep.mubr.bf16.mxu0 %v467_v12  ;;  %2759 = vmatprep.mubr.bf16.mxu1 %v498_v13 }
 0x163   : > { %1168 = vmatmul.mubr.bf16.gmra.mrb[24].mxu0 %v466_v16  ;;  %2760 = vmatmul.mubr.bf16.gmra.mrb[64].mxu1 %v503_v17 }
 0x164   : > { %1175 = vmatprep.mubr.bf16.mxu0 %v472_v18  ;;  %2763 = vmatprep.mubr.bf16.mxu1 %v508_v19 }
 0x16b   : > { %1176 = vmatmul.mubr.bf16.gmra.mrb[28].mxu0 %v471_v22  ;;  %2764 = vmatmul.mubr.bf16.gmra.mrb[68].mxu1 %v513_v23 }
 0x16c   : > { %1183 = vmatprep.mubr.bf16.mxu0 %v477_v24  ;;  %2767 = vmatprep.mubr.bf16.mxu1 %v518_v25 }
 0x173   : > { %1184 = vmatmul.mubr.bf16.gmra.mrb[32].mxu0 %v476_v28  ;;  %2768 = vmatmul.mubr.bf16.gmra.mrb[72].mxu1 %v523_v29 }
 0x174   : > { %1191 = vmatprep.mubr.bf16.mxu0 %v482_v30  ;;  %2771 = vmatprep.mubr.bf16.mxu1 %v528_v31 }
 0x17b   : > { %1192 = vmatmul.mubr.bf16.gmra.mrb[36].mxu0 %v481_v33  ;;  %2772 = vmatmul.mubr.bf16.gmra.mrb[76].mxu1 %v533_v34 }
 0x17c   : > { %1199 = vmatprep.mubr.bf16.mxu0 %v487_v35 }
 0x183   : > { %1200 = vmatmul.mubr.bf16.gmra.mrb[40].mxu0 %v486_v37 }
 0x184   : > { %1207 = vmatprep.mubr.bf16.mxu0 %v492_v38 }
 0x18b   : > { %1208 = vmatmul.mubr.bf16.gmra.mrb[44].mxu0 %v491_v40 }
 0x18c   : > { %1215 = vmatprep.mubr.bf16.mxu0 %v497_v41  ;;  %v3068_v41 = vld [vmem:[#allocation9] sm:$0xff]  }
 0x18d   : > { %2775 = vmatprep.subr.bf16.mxu1 %v3068_v41 }
 0x18e   : > { %2776 = vmatpush3.bf16.msra.mxu1 %v3068_v41  ;;  %v3074_v41 = vld [vmem:[#allocation9 + $0x30] sm:$0xff]  }
 0x18f   : > { %2777 = vmatprep.subr.bf16.mxu1 %v3069_v48 }
 0x192   : > { %2778 = vmatpush3.bf16.msra.mxu1 %v3069_v48 }
 0x193   : > { %1216 = vmatmul.mubr.bf16.gmra.mrb[48].mxu0 %v496_v42  ;;  %2779 = vmatprep.subr.bf16.mxu1 %v3070_v54 }
 0x194   : > { %1223 = vmatprep.mubr.bf16.mxu0 %v502_v43 }
 0x196   : > { %2780 = vmatpush3.bf16.msra.mxu1 %v3070_v54 }
 0x197   : > { %2781 = vmatprep.subr.bf16.mxu1 %v3071_v1 }
 0x19a   : > { %2782 = vmatpush3.bf16.msra.mxu1 %v3071_v1 }
 0x19b   : > { %1224 = vmatmul.mubr.bf16.gmra.mrb[52].mxu0 %v501_v46 }
 0x19c   : > { %1231 = vmatprep.mubr.bf16.mxu0 %v507_v47 }
 0x1a3   : > { %1232 = vmatmul.mubr.bf16.gmra.mrb[56].mxu0 %v506_v49 }
 0x1a4   : > { %1239 = vmatprep.mubr.bf16.mxu0 %v512_v50 }
 0x1ab   : > { %1240 = vmatmul.mubr.bf16.gmra.mrb[60].mxu0 %v511_v52 }
 0x1ac   : > { %1247 = vmatprep.mubr.bf16.mxu0 %v517_v53 }
 0x1b3   : > { %1248 = vmatmul.mubr.bf16.gmra.mrb[64].mxu0 %v516_v55 }
 0x1b4   : > { %1255 = vmatprep.mubr.bf16.mxu0 %v522_v56 }
 0x1b6   : > { %v3754_v58 = vpop.f32.mrb[0].mxu1 }
 0x1b7   : > { %v1010_v60 = vpop.f32.mrb[1].mxu1 }
 0x1b8   : > { %v3756_v62 = vpop.f32.mrb[2].mxu1 }
 0x1b9   : > { %v1013_v63 = vpop.f32.mrb[3].mxu1 }
 0x1bb   : > { %1256 = vmatmul.mubr.bf16.gmra.mrb[68].mxu0 %v521_v59 }
 0x1bc   : > { %1263 = vmatprep.mubr.bf16.mxu0 %v527_v61 }
 0x1be   : > { %v3759_v2 = vpop.f32.mrb[4].mxu1 }
 0x1bf   : > { %v1018_v4 = vpop.f32.mrb[5].mxu1 }
 0x1c0   : > { %v3761_v6 = vpop.f32.mrb[6].mxu1 }
 0x1c1   : > { %v1021_v7 = vpop.f32.mrb[7].mxu1 }
 0x1c3   : > { %1264 = vmatmul.mubr.bf16.gmra.mrb[72].mxu0 %v526_v3 }
 0x1c4   : > { %1271 = vmatprep.mubr.bf16.mxu0 %v532_v5 }
 0x1c6   : > { %v3763_v8 = vpop.f32.mrb[8].mxu1 }
 0x1c7   : > { %v1026_v10 = vpop.f32.mrb[9].mxu1 }
 0x1c8   : > { %v3765_v11 = vpop.f32.mrb[10].mxu1  ;;  %v3072_v10 = vld [vmem:[#allocation9 + $0x20] sm:$0xff]  }
 0x1c9   : > { %v1029_v12 = vpop.f32.mrb[11].mxu1  ;;  %2783 = vmatprep.subr.bf16.mxu1 %v3072_v10 }
 0x1ca   : > { %2784 = vmatpush3.bf16.msra.mxu1 %v3072_v10 }
 0x1cb   : > { %1272 = vmatmul.mubr.bf16.gmra.mrb[76].mxu0 %v531_v9 }
 0x1ce   : > { %v3767_v13 = vpop.f32.mrb[12].mxu1 }
 0x1cf   : > { %v1034_v14 = vpop.f32.mrb[13].mxu1 }
 0x1d0   : > { %v3769_v15 = vpop.f32.mrb[14].mxu1 }
 0x1d1   : > { %v1037_v16 = vpop.f32.mrb[15].mxu1 }
 0x1d6   : > { %v3771_v17 = vpop.f32.mrb[16].mxu1 }
 0x1d7   : > { %v1042_v18 = vpop.f32.mrb[17].mxu1 }
 0x1d8   : > { %v3773_v19 = vpop.f32.mrb[18].mxu1 }
 0x1d9   : > { %v1045_v20 = vpop.f32.mrb[19].mxu1 }
 0x1de   : > { %v3775_v21 = vpop.f32.mrb[20].mxu1 }
 0x1df   : > { %v1050_v22 = vpop.f32.mrb[21].mxu1 }
 0x1e0   : > { %v3777_v23 = vpop.f32.mrb[22].mxu1 }
 0x1e1   : > { %v1053_v24 = vpop.f32.mrb[23].mxu1 }
 0x1e6   : > { %v3779_v25 = vpop.f32.mrb[24].mxu1 }
 0x1e7   : > { %v1058_v26 = vpop.f32.mrb[25].mxu1 }
 0x1e8   : > { %v3781_v27 = vpop.f32.mrb[26].mxu1 }
 0x1e9   : > { %v1061_v28 = vpop.f32.mrb[27].mxu1 }
 0x1ea   : > { %v3073_v28 = vld [vmem:[#allocation9 + $0x28] sm:$0xff]  }
 0x1eb   : > { %2785 = vmatprep.subr.bf16.mxu1 %v3073_v28 }
 0x1ec   : > { %2786 = vmatpush3.bf16.msra.mxu1 %v3073_v28 }
 0x1ed   : > { %2787 = vmatprep.subr.bf16.mxu1 %v3074_v41 }
 0x1ee   : > { %v3783_v29 = vpop.f32.mrb[28].mxu1 }
 0x1ef   : > { %v1066_v30 = vpop.f32.mrb[29].mxu1 }
 0x1f0   : > { %v3785_v31 = vpop.f32.mrb[30].mxu1  ;;  %2788 = vmatpush3.bf16.msra.mxu1 %v3074_v41 }
 0x1f1   : > { %v1069_v32 = vpop.f32.mrb[31].mxu1 }
 0x1f6   : > { %v3787_v33 = vpop.f32.mrb[32].mxu1 }
 0x1f7   : > { %v1074_v34 = vpop.f32.mrb[33].mxu1 }
 0x1f8   : > { %v3789_v35 = vpop.f32.mrb[34].mxu1 }
 0x1f9   : > { %v1077_v36 = vpop.f32.mrb[35].mxu1 }
 0x1fe   : > { %v3791_v37 = vpop.f32.mrb[36].mxu1 }
 0x1ff   : > { %v1082_v38 = vpop.f32.mrb[37].mxu1 }
 0x200   : > { %v3793_v39 = vpop.f32.mrb[38].mxu1 }
 0x201   : > { %v1085_v40 = vpop.f32.mrb[39].mxu1 }
 0x206   : > { %v1121_v0 = vpop.f32.mrb[0].mxu0  ;;  %v2737_v42 = vpop.f32.mrb[40].mxu1 }
 0x207   : > { %v1123_v43 = vpop.f32.mrb[1].mxu0  ;;  %v1314_v44 = vpop.f32.mrb[41].mxu1 }
 0x208   : > { %v3795_v45 = vadd.f32 %v1314_v44, %v1121_v0  ;;  %v1124_v46 = vpop.f32.mrb[2].mxu0  ;;  %v2738_v47 = vpop.f32.mrb[42].mxu1 }
 0x209   : > { %v1126_v49 = vpop.f32.mrb[3].mxu0  ;;  %v1317_v50 = vpop.f32.mrb[43].mxu1 }
 0x20a   : > { %v1596_v51 = vadd.f32 1.0, %v3795_v45  ;;  %v3798_v52 = vadd.f32 %v1317_v50, %v1124_v46  ;;  %v3075_v50 = vld [vmem:[#allocation9 + $0x38] sm:$0xff]  }
 0x20b   : > { %2789 = vmatprep.subr.bf16.mxu1 %v3075_v50 }
 0x20c   : > { %3076 = vrcp.f32 %v1596_v51  ;;  %v1597_v53 = vadd.f32 1.0, %v3798_v52  ;;  %2790 = vmatpush3.bf16.msra.mxu1 %v3075_v50 }
 0x20e   : > { %v1129_v55 = vpop.f32.mrb[4].mxu0  ;;  %v2741_v56 = vpop.f32.mrb[44].mxu1  ;;  %3078 = vrcp.f32 %v1597_v53 }
 0x20f   : > { %v3801_v57 = vadd.f32 %v2737_v42, %v1129_v55  ;;  %v1131_v59 = vpop.f32.mrb[5].mxu0  ;;  %v1330_v60 = vpop.f32.mrb[45].mxu1 }
 0x210   : > { %v1132_v61 = vpop.f32.mrb[6].mxu0  ;;  %v2742_v63 = vpop.f32.mrb[46].mxu1 }
 0x211   : > { %v1598_v3 = vadd.f32 1.0, %v3801_v57  ;;  %v3804_v4 = vadd.f32 %v2738_v47, %v1132_v61  ;;  %v1134_v5 = vpop.f32.mrb[7].mxu0  ;;  %v1333_v7 = vpop.f32.mrb[47].mxu1 }
 0x213   : > { %3080 = vrcp.f32 %v1598_v3  ;;  %v1599_v9 = vadd.f32 1.0, %v3804_v4 }
 0x215   : > { %3082 = vrcp.f32 %v1599_v9 }
 0x216   : > { %v3077_v12 = vpop.eup %3076  ;;  %v1137_v14 = vpop.f32.mrb[8].mxu0 }
 0x217   : > { %v3807_v16 = vpop.f32.mrb[48].mxu1  ;;  %v3809_v18 = vadd.f32 %v1330_v60, %v1137_v14  ;;  %1798 = vperm.xlu0 %3026, %v3077_v12   ;;  %v1139_v20 = vpop.f32.mrb[9].mxu0 }
 0x218   : > { %v1346_v22 = vpop.f32.mrb[49].mxu1  ;;  %v1140_v24 = vpop.f32.mrb[10].mxu0 }
 0x219   : > { %v3811_v26 = vpop.f32.mrb[50].mxu1  ;;  %v1600_v30 = vadd.f32 1.0, %v3809_v18  ;;  %v3814_v32 = vadd.f32 %v1333_v7, %v1140_v24  ;;  %v1142_v34 = vpop.f32.mrb[11].mxu0 }
 0x21a   : > { %v1349_v36 = vpop.f32.mrb[51].mxu1  ;;  %v3079_v38 = vpop.eup %3078 }
 0x21b   : > { %3084 = vrcp.f32 %v1600_v30  ;;  %v1601_v40 = vadd.f32 1.0, %v3814_v32  ;;  %1803 = vperm.xlu0 %3026, %v3079_v38  }
 0x21d   : > { %v3081_v0 = vpop.eup %3080  ;;  %3086 = vrcp.f32 %v1601_v40 }
 0x21e   : > { %1808 = vperm.xlu1 %3027, %v3081_v0   ;;  %v1145_v42 = vpop.f32.mrb[12].mxu0  ;;  %v3817_v43 = vpop.f32.mrb[52].mxu1 }
 0x21f   : > { %v3819_v44 = vadd.f32 %v2741_v56, %v1145_v42  ;;  %v1147_v46 = vpop.f32.mrb[13].mxu0  ;;  %v1362_v47 = vpop.f32.mrb[53].mxu1 }
 0x220   : > { %v1148_v48 = vpop.f32.mrb[14].mxu0  ;;  %v3821_v49 = vpop.f32.mrb[54].mxu1 }
 0x221   : > { %v3083_v51 = vpop.eup %3082  ;;  %v1602_v53 = vadd.f32 1.0, %v3819_v44  ;;  %v3824_v54 = vadd.f32 %v2742_v63, %v1148_v48  ;;  %v1150_v55 = vpop.f32.mrb[15].mxu0 }
 0x222   : > { %v1365_v59 = vpop.f32.mrb[55].mxu1  ;;  %1813 = vperm.xlu1 %3027, %v3083_v51  }
 0x223   : > { %3088 = vrcp.f32 %v1602_v53  ;;  %v1603_v56 = vadd.f32 1.0, %v3824_v54 }
 0x225   : > { %v3085_v60 = vpop.eup %3084  ;;  %3090 = vrcp.f32 %v1603_v56 }
 0x226   : > { %1818 = vperm.xlu0 %3026, %v3085_v60   ;;  %v1153_v61 = vpop.f32.mrb[16].mxu0  ;;  %v3827_v1 = vpop.f32.mrb[56].mxu1 }
 0x227   : > { %v3087_v3 = vpop.eup %3086  ;;  %v3829_v5 = vadd.f32 %v1346_v22, %v1153_v61  ;;  %v1155_v7 = vpop.f32.mrb[17].mxu0 }
 0x228   : > { %v3831_v63 = vpop.f32.mrb[57].mxu1  ;;  %1823 = vperm.xlu1 %3027, %v3087_v3   ;;  %v1156_v9 = vpop.f32.mrb[18].mxu0 }
 0x229   : > { %v3833_v10 = vpop.f32.mrb[58].mxu1  ;;  %v1604_v12 = vadd.f32 1.0, %v3829_v5  ;;  %v3836_v14 = vadd.f32 %v1349_v36, %v1156_v9  ;;  %v1158_v20 = vpop.f32.mrb[19].mxu0 }
 0x22a   : > { %v3838_v24 = vpop.f32.mrb[59].mxu1 }
 0x22b   : > { %3092 = vrcp.f32 %v1604_v12  ;;  %v1605_v28 = vadd.f32 1.0, %v3836_v14 }
 0x22d   : > { %v3089_v30 = vpop.eup %3088  ;;  %3094 = vrcp.f32 %v1605_v28 }
 0x22e   : > { %1828 = vperm.xlu0 %3026, %v3089_v30   ;;  %v1161_v22 = vpop.f32.mrb[20].mxu0  ;;  %v3841_v34 = vpop.f32.mrb[60].mxu1 }
 0x22f   : > { %v3091_v38 = vpop.eup %3090  ;;  %v3844_v40 = vadd.f32 %v3807_v16, %v1161_v22  ;;  %v1163_v41 = vpop.f32.mrb[21].mxu0 }
 0x230   : > { %v3846_v0 = vpop.f32.mrb[61].mxu1  ;;  %1833 = vperm.xlu1 %3027, %v3091_v38   ;;  %v1164_v36 = vpop.f32.mrb[22].mxu0 }
 0x231   : > { %v3848_v42 = vpop.f32.mrb[62].mxu1  ;;  %v1606_v46 = vadd.f32 1.0, %v3844_v40  ;;  %v3852_v48 = vadd.f32 %v3811_v26, %v1164_v36  ;;  %v1166_v50 = vpop.f32.mrb[23].mxu0 }
 0x232   : > { %v3854_v51 = vpop.f32.mrb[63].mxu1 }
 0x233   : > { %4283 = vst [vmem:[#allocation21_spill] sm:$0xff] %v3852_v48  ;;  %3096 = vrcp.f32 %v1606_v46  ;;  %v1607_v53 = vadd.f32 1.0, %v3852_v48 }
 0x235   : > { %v3093_v16 = vpop.eup %3092  ;;  %3098 = vrcp.f32 %v1607_v53 }
 0x236   : > { %1838 = vperm.xlu0 %3026, %v3093_v16   ;;  %v1169_v55 = vpop.f32.mrb[24].mxu0  ;;  %v3857_v56 = vpop.f32.mrb[64].mxu1 }
 0x237   : > { %v3095_v60 = vpop.eup %3094  ;;  %v3859_v61 = vadd.f32 %v1362_v47, %v1169_v55  ;;  %v1171_v3 = vpop.f32.mrb[25].mxu0 }
 0x238   : > { %v3861_v7 = vpop.f32.mrb[65].mxu1  ;;  %1843 = vperm.xlu1 %3027, %v3095_v60   ;;  %v1172_v26 = vpop.f32.mrb[26].mxu0 }
 0x239   : > { %4284 = vst [vmem:[#allocation22_spill] sm:$0xff] %v3859_v61  ;;  %v3863_v9 = vpop.f32.mrb[66].mxu1  ;;  %v1608_v12 = vadd.f32 1.0, %v3859_v61  ;;  %v3866_v20 = vadd.f32 %v1365_v59, %v1172_v26  ;;  %v1174_v28 = vpop.f32.mrb[27].mxu0 }
 0x23a   : > { %v3868_v30 = vpop.f32.mrb[67].mxu1 }
 0x23b   : > { %4285 = vst [vmem:[#allocation23_spill] sm:$0xff] %v3866_v20  ;;  %3100 = vrcp.f32 %v1608_v12  ;;  %v1609_v22 = vadd.f32 1.0, %v3866_v20 }
 0x23d   : > { %v3097_v38 = vpop.eup %3096  ;;  %3102 = vrcp.f32 %v1609_v22 }
 0x23e   : > { %1848 = vperm.xlu0 %3026, %v3097_v38   ;;  %v1177_v47 = vpop.f32.mrb[28].mxu0  ;;  %v3871_v41 = vpop.f32.mrb[68].mxu1 }
 0x23f   : > { %v3099_v36 = vpop.eup %3098  ;;  %v3874_v46 = vadd.f32 %v3817_v43, %v1177_v47  ;;  %v1179_v50 = vpop.f32.mrb[29].mxu0 }
 0x240   : > { %v3876_v53 = vpop.f32.mrb[69].mxu1  ;;  %1853 = vperm.xlu1 %3027, %v3099_v36   ;;  %v1180_v59 = vpop.f32.mrb[30].mxu0 }
 0x241   : > { %4286 = vst [vmem:[#allocation24_spill] sm:$0xff] %v3874_v46  ;;  %v3878_v16 = vpop.f32.mrb[70].mxu1  ;;  %v1610_v55 = vadd.f32 1.0, %v3874_v46  ;;  %v3882_v60 = vadd.f32 %v3821_v49, %v1180_v59  ;;  %v1182_v3 = vpop.f32.mrb[31].mxu0 }
 0x242   : > { %v3884_v26 = vpop.f32.mrb[71].mxu1 }
 0x243   : > { %4287 = vst [vmem:[#allocation25_spill] sm:$0xff] %v3882_v60  ;;  %3104 = vrcp.f32 %v1610_v55  ;;  %v1611_v12 = vadd.f32 1.0, %v3882_v60 }
 0x245   : > { %v3101_v43 = vpop.eup %3100  ;;  %3106 = vrcp.f32 %v1611_v12 }
 0x246   : > { %1858 = vperm.xlu0 %3026, %v3101_v43   ;;  %v1185_v28 = vpop.f32.mrb[32].mxu0  ;;  %v3887_v22 = vpop.f32.mrb[72].mxu1 }
 0x247   : > { %v3103_v38 = vpop.eup %3102  ;;  %v3890_v47 = vadd.f32 %v3831_v63, %v1185_v28  ;;  %v1187_v36 = vpop.f32.mrb[33].mxu0 }
 0x248   : > { %v3892_v50 = vpop.f32.mrb[73].mxu1  ;;  %1863 = vperm.xlu1 %3027, %v3103_v38   ;;  %v1188_v49 = vpop.f32.mrb[34].mxu0 }
 0x249   : > { %4288 = vst [vmem:[#allocation26_spill] sm:$0xff] %v3890_v47  ;;  %v3894_v59 = vpop.f32.mrb[74].mxu1  ;;  %v1612_v55 = vadd.f32 1.0, %v3890_v47  ;;  %v3898_v3 = vadd.f32 %v3838_v24, %v1188_v49  ;;  %v1190_v12 = vpop.f32.mrb[35].mxu0 }
 0x24a   : > { %v3900_v43 = vpop.f32.mrb[75].mxu1 }
 0x24b   : > { %4289 = vst [vmem:[#allocation27_spill] sm:$0xff] %v3898_v3  ;;  %3108 = vrcp.f32 %v1612_v55  ;;  %v1613_v60 = vadd.f32 1.0, %v3898_v3 }
 0x24d   : > { %v3105_v63 = vpop.eup %3104  ;;  %3110 = vrcp.f32 %v1613_v60 }
 0x24e   : > { %1868 = vperm.xlu0 %3026, %v3105_v63   ;;  %v1193_v28 = vpop.f32.mrb[36].mxu0  ;;  %v3903_v36 = vpop.f32.mrb[76].mxu1 }
 0x24f   : > { %v3107_v38 = vpop.eup %3106  ;;  %v3906_v46 = vadd.f32 %v3827_v1, %v1193_v28  ;;  %v1195_v47 = vpop.f32.mrb[37].mxu0 }
 0x250   : > { %v3908_v20 = vpop.f32.mrb[77].mxu1  ;;  %1873 = vperm.xlu1 %3027, %v3107_v38   ;;  %v1196_v24 = vpop.f32.mrb[38].mxu0 }
 0x251   : > { %4290 = vst [vmem:[#allocation28_spill] sm:$0xff] %v3906_v46  ;;  %v3910_v49 = vpop.f32.mrb[78].mxu1  ;;  %v1614_v55 = vadd.f32 1.0, %v3906_v46  ;;  %v3914_v12 = vadd.f32 %v3833_v10, %v1196_v24  ;;  %v1198_v60 = vpop.f32.mrb[39].mxu0 }
 0x252   : > { %v3916_v63 = vpop.f32.mrb[79].mxu1 }
 0x253   : > { %3112 = vrcp.f32 %v1614_v55  ;;  %v1615_v3 = vadd.f32 1.0, %v3914_v12 }
 0x255   : > { %v3109_v1 = vpop.eup %3108  ;;  %3114 = vrcp.f32 %v1615_v3 }
 0x256   : > { %1878 = vperm.xlu0 %3026, %v3109_v1   ;;  %v1201_v47 = vpop.f32.mrb[40].mxu0 }
 0x257   : > { %v3111_v28 = vpop.eup %3110  ;;  %v1202_v38 = vadd.f32 %v1201_v47, %v3754_v58  ;;  %v1203_v61 = vpop.f32.mrb[41].mxu0 }
 0x258   : > { %1883 = vperm.xlu1 %3027, %v3111_v28   ;;  %v1204_v48 = vpop.f32.mrb[42].mxu0 }
 0x259   : > { %v3921_v46 = vadd.f32 %v3846_v0, %v1202_v38  ;;  %v1205_v10 = vadd.f32 %v1204_v48, %v3756_v62  ;;  %v1206_v24 = vpop.f32.mrb[43].mxu0 }
 0x25b   : > { %v1616_v55 = vadd.f32 1.0, %v3921_v46  ;;  %v3926_v60 = vadd.f32 %v3854_v51, %v1205_v10 }
 0x25d   : > { %v3113_v3 = vpop.eup %3112  ;;  %3116 = vrcp.f32 %v1616_v55  ;;  %v1617_v1 = vadd.f32 1.0, %v3926_v60 }
 0x25e   : > { %1888 = vperm.xlu0 %3026, %v3113_v3   ;;  %v1209_v58 = vpop.f32.mrb[44].mxu0 }
 0x25f   : > { %v3115_v61 = vpop.eup %3114  ;;  %3118 = vrcp.f32 %v1617_v1  ;;  %v1210_v47 = vadd.f32 %v1209_v58, %v3759_v2  ;;  %v1211_v0 = vpop.f32.mrb[45].mxu0 }
 0x260   : > { %1893 = vperm.xlu1 %3027, %v3115_v61   ;;  %v1212_v28 = vpop.f32.mrb[46].mxu0 }
 0x261   : > { %v3931_v62 = vadd.f32 %v3841_v34, %v1210_v47  ;;  %v1213_v48 = vadd.f32 %v1212_v28, %v3761_v6  ;;  %v1214_v51 = vpop.f32.mrb[47].mxu0 }
 0x263   : > { %v1618_v38 = vadd.f32 1.0, %v3931_v62  ;;  %v3936_v10 = vadd.f32 %v3848_v42, %v1213_v48 }
 0x265   : > { %3120 = vrcp.f32 %v1618_v38  ;;  %v1619_v24 = vadd.f32 1.0, %v3936_v10 }
 0x266   : > { %v1217_v55 = vpop.f32.mrb[48].mxu0 }
 0x267   : > { %v3117_v3 = vpop.eup %3116  ;;  %3122 = vrcp.f32 %v1619_v24  ;;  %v1218_v2 = vadd.f32 %v1217_v55, %v3763_v8  ;;  %v1219_v1 = vpop.f32.mrb[49].mxu0 }
 0x268   : > { %v1220_v58 = vpop.f32.mrb[50].mxu0  ;;  %1898 = vperm.xlu0 %3026, %v3117_v3  }
 0x269   : > { %v3119_v34 = vpop.eup %3118  ;;  %v1221_v6 = vadd.f32 %v1220_v58, %v3765_v11  ;;  %v3942_v61 = vadd.f32 %v3861_v7, %v1218_v2  ;;  %v1222_v47 = vpop.f32.mrb[51].mxu0 }
 0x26a   : > { %1903 = vperm.xlu1 %3027, %v3119_v34  }
 0x26b   : > { %v1620_v42 = vadd.f32 1.0, %v3942_v61  ;;  %v3946_v0 = vadd.f32 %v3868_v30, %v1221_v6 }
 0x26d   : > { %3124 = vrcp.f32 %v1620_v42  ;;  %v1621_v28 = vadd.f32 1.0, %v3946_v0 }
 0x26e   : > { %v1225_v8 = vpop.f32.mrb[52].mxu0 }
 0x26f   : > { %v3121_v48 = vpop.eup %3120  ;;  %3126 = vrcp.f32 %v1621_v28  ;;  %v1226_v51 = vadd.f32 %v1225_v8, %v3767_v13  ;;  %v1227_v38 = vpop.f32.mrb[53].mxu0 }
 0x270   : > { %v1228_v11 = vpop.f32.mrb[54].mxu0  ;;  %1908 = vperm.xlu0 %3026, %v3121_v48  }
 0x271   : > { %v3123_v7 = vpop.eup %3122  ;;  %v3951_v24 = vadd.f32 %v3857_v56, %v1226_v51  ;;  %v1229_v55 = vadd.f32 %v1228_v11, %v3769_v15  ;;  %v1230_v3 = vpop.f32.mrb[55].mxu0 }
 0x272   : > { %1913 = vperm.xlu1 %3027, %v3123_v7  }
 0x273   : > { %v1622_v30 = vadd.f32 1.0, %v3951_v24  ;;  %v3956_v2 = vadd.f32 %v3863_v9, %v1229_v55 }
 0x275   : > { %3128 = vrcp.f32 %v1622_v30  ;;  %v1623_v1 = vadd.f32 1.0, %v3956_v2 }
 0x276   : > { %v1233_v13 = vpop.f32.mrb[56].mxu0 }
 0x277   : > { %v3125_v58 = vpop.eup %3124  ;;  %3130 = vrcp.f32 %v1623_v1  ;;  %v1234_v34 = vadd.f32 %v1233_v13, %v3771_v17  ;;  %v1235_v6 = vpop.f32.mrb[57].mxu0 }
 0x278   : > { %v1236_v56 = vpop.f32.mrb[58].mxu0  ;;  %1918 = vperm.xlu0 %3026, %v3125_v58  }
 0x279   : > { %v3127_v47 = vpop.eup %3126  ;;  %v1237_v15 = vadd.f32 %v1236_v56, %v3773_v19  ;;  %v3962_v42 = vadd.f32 %v3876_v53, %v1234_v34  ;;  %v1238_v28 = vpop.f32.mrb[59].mxu0 }
 0x27a   : > { %1923 = vperm.xlu1 %3027, %v3127_v47  }
 0x27b   : > { %v1624_v9 = vadd.f32 1.0, %v3962_v42  ;;  %v3966_v8 = vadd.f32 %v3884_v26, %v1237_v15 }
 0x27d   : > { %3132 = vrcp.f32 %v1624_v9  ;;  %v1625_v48 = vadd.f32 1.0, %v3966_v8 }
 0x27e   : > { %v1241_v17 = vpop.f32.mrb[60].mxu0 }
 0x27f   : > { %v3129_v51 = vpop.eup %3128  ;;  %3134 = vrcp.f32 %v1625_v48  ;;  %v1242_v38 = vadd.f32 %v1241_v17, %v3775_v21  ;;  %v1243_v11 = vpop.f32.mrb[61].mxu0 }
 0x280   : > { %v1244_v19 = vpop.f32.mrb[62].mxu0  ;;  %1928 = vperm.xlu0 %3026, %v3129_v51  }
 0x281   : > { %v3131_v53 = vpop.eup %3130  ;;  %v3971_v7 = vadd.f32 %v3871_v41, %v1242_v38  ;;  %v1245_v55 = vadd.f32 %v1244_v19, %v3777_v23  ;;  %v1246_v3 = vpop.f32.mrb[63].mxu0 }
 0x282   : > { %1933 = vperm.xlu1 %3027, %v3131_v53  }
 0x283   : > { %v1626_v26 = vadd.f32 1.0, %v3971_v7  ;;  %v3976_v30 = vadd.f32 %v3878_v16, %v1245_v55 }
 0x285   : > { %3136 = vrcp.f32 %v1626_v26  ;;  %v1627_v1 = vadd.f32 1.0, %v3976_v30 }
 0x286   : > { %v1249_v21 = vpop.f32.mrb[64].mxu0 }
 0x287   : > { %v3133_v13 = vpop.eup %3132  ;;  %3138 = vrcp.f32 %v1627_v1  ;;  %v1250_v58 = vadd.f32 %v1249_v21, %v3779_v25  ;;  %v1251_v34 = vpop.f32.mrb[65].mxu0 }
 0x288   : > { %v1252_v41 = vpop.f32.mrb[66].mxu0  ;;  %1938 = vperm.xlu0 %3026, %v3133_v13  }
 0x289   : > { %v3135_v6 = vpop.eup %3134  ;;  %v1253_v23 = vadd.f32 %v1252_v41, %v3781_v27  ;;  %v3982_v56 = vadd.f32 %v3892_v50, %v1250_v58  ;;  %v1254_v47 = vpop.f32.mrb[67].mxu0 }
 0x28a   : > { %1943 = vperm.xlu1 %3027, %v3135_v6   ;;  %v2644_v47 = vld [vmem:[%s3639_s10 + $0x8] sm:$0xff]  }
 0x28b   : > { %v1628_v16 = vadd.f32 1.0, %v3982_v56  ;;  %v3986_v15 = vadd.f32 %v3900_v43, %v1253_v23  ;;  %v2565_v43 = vld [vmem:[%s3639_s10] sm:$0xff]  }
 0x28c   : > { %v2566_v55 = vunpack.c.l.bf16 %v2565_v43  ;;  %v2567_v3 = vunpack.c.h.bf16 %v2565_v43 }
 0x28d   : > { %3140 = vrcp.f32 %v1628_v16  ;;  %v1629_v25 = vadd.f32 1.0, %v3986_v15 }
 0x28e   : > { %v1257_v28 = vpop.f32.mrb[68].mxu0  ;;  %v1756_v34 = vadd.f32 %v2566_v55, %v3795_v45  ;;  %v1757_v23 = vadd.f32 %v2567_v3, %v3798_v52  ;;  %v2570_v45 = vunpack.c.l.bf16 %v2644_v47 }
 0x28f   : > { %v3137_v9 = vpop.eup %3136  ;;  %3142 = vrcp.f32 %v1629_v25  ;;  %v1258_v48 = vadd.f32 %v1257_v28, %v3783_v29  ;;  %v1259_v27 = vpop.f32.mrb[69].mxu0 }
 0x290   : > { %v1260_v17 = vpop.f32.mrb[70].mxu0  ;;  %1948 = vperm.xlu0 %3026, %v3137_v9   ;;  %v1758_v43 = vadd.f32 %v2570_v45, %v3801_v57 }
 0x291   : > { %v3139_v50 = vpop.eup %3138  ;;  %v3991_v51 = vadd.f32 %v3887_v22, %v1258_v48  ;;  %v1261_v38 = vadd.f32 %v1260_v17, %v3785_v31  ;;  %v1262_v11 = vpop.f32.mrb[71].mxu0  ;;  %v2571_v48 = vunpack.c.h.bf16 %v2644_v47 }
 0x292   : > { %1953 = vperm.xlu1 %3027, %v3139_v50   ;;  %v2645_v11 = vld [vmem:[%s3639_s10 + $0x10] sm:$0xff]  }
 0x293   : > { %v1630_v19 = vadd.f32 1.0, %v3991_v51  ;;  %v3997_v53 = vadd.f32 %v3894_v59, %v1261_v38 }
 0x295   : > { %3144 = vrcp.f32 %v1630_v19  ;;  %v1631_v29 = vadd.f32 1.0, %v3997_v53  ;;  %v1759_v19 = vadd.f32 %v2571_v48, %v3804_v4 }
 0x296   : > { %v1799_v26 = vpop.permute.xlu0 %1798  ;;  %v1265_v1 = vpop.f32.mrb[72].mxu0 }
 0x297   : > { %v3141_v22 = vpop.eup %3140  ;;  %3146 = vrcp.f32 %v1631_v29  ;;  %v1266_v31 = vadd.f32 %v1265_v1, %v3787_v33  ;;  %v1267_v21 = vpop.f32.mrb[73].mxu0  ;;  %v1996_v25 = vmul.f32 %v1799_v26, %v1756_v34 }
 0x298   : > { %v1268_v13 = vpop.f32.mrb[74].mxu0  ;;  %1958 = vperm.xlu0 %3026, %v3141_v22   ;;  %v2575_v21 = vunpack.c.h.bf16 %v2645_v11 }
 0x299   : > { %v3143_v58 = vpop.eup %3142  ;;  %v1269_v59 = vadd.f32 %v1268_v13, %v3789_v35  ;;  %v4004_v41 = vadd.f32 %v3908_v20, %v1266_v31  ;;  %v1270_v6 = vpop.f32.mrb[75].mxu0 }
 0x29a   : > { %v1804_v16 = vpop.permute.xlu0 %1803  ;;  %1963 = vperm.xlu1 %3027, %v3143_v58   ;;  %v1761_v34 = vadd.f32 %v2575_v21, %v3814_v32  ;;  %v4291_v21 = vld [vmem:[#allocation21_spill] sm:$0xff] }
 0x29b   : > { %v1632_v33 = vadd.f32 1.0, %v4004_v41  ;;  %v4010_v28 = vadd.f32 %v3916_v63, %v1269_v59  ;;  %v1997_v9 = vmul.f32 %v1804_v16, %v1757_v23  ;;  %v2646_v23 = vld [vmem:[%s3639_s10 + $0x18] sm:$0xff]  }
 0x29d   : > { %3148 = vrcp.f32 %v1632_v33  ;;  %v1633_v35 = vadd.f32 1.0, %v4010_v28  ;;  %v2036_v20 = vpack.c.bf16 %v1997_v9, %v1996_v25  ;;  %v1809_v27 = vpop.permute.xlu1 %1808  ;;  %v2578_v33 = vunpack.c.l.bf16 %v2646_v23 }
 0x29e   : > { %v1273_v17 = vpop.f32.mrb[76].mxu0  ;;  %v1998_v22 = vmul.f32 %v1809_v27, %v1758_v43  ;;  %v2579_v9 = vunpack.c.h.bf16 %v2646_v23 }
 0x29f   : > { %v3145_v52 = vpop.eup %3144  ;;  %3150 = vrcp.f32 %v1633_v35  ;;  %v1274_v50 = vadd.f32 %v1273_v17, %v3791_v37  ;;  %v1275_v38 = vpop.f32.mrb[77].mxu0  ;;  %2791 = vmatprep.mubr.bf16.mxu1 %v2036_v20  ;;  %v2574_v37 = vunpack.c.l.bf16 %v2645_v11  ;;  %v2647_v20 = vld [vmem:[%s3639_s10 + $0x20] sm:$0xff]  }
 0x2a0   : > { %v1276_v63 = vpop.f32.mrb[78].mxu0  ;;  %1968 = vperm.xlu0 %3026, %v3145_v52   ;;  %v1763_v48 = vadd.f32 %v2579_v9, %v3824_v54  ;;  %v2582_v38 = vunpack.c.l.bf16 %v2647_v20  ;;  %v2583_v11 = vunpack.c.h.bf16 %v2647_v20  ;;  %v4295_v20 = vld [vmem:[#allocation25_spill] sm:$0xff] }
 0x2a1   : > { %v3147_v29 = vpop.eup %3146  ;;  %v4018_v55 = vadd.f32 %v3903_v36, %v1274_v50  ;;  %v1277_v3 = vadd.f32 %v1276_v63, %v3793_v39  ;;  %v1814_v26 = vpop.permute.xlu1 %1813  ;;  %v1760_v39 = vadd.f32 %v2574_v37, %v3809_v18  ;;  %v1762_v18 = vadd.f32 %v2578_v33, %v3819_v44 }
 0x2a2   : > { %v1278_v1 = vpop.f32.mrb[79].mxu0  ;;  %v1999_v31 = vmul.f32 %v1814_v26, %v1759_v19  ;;  %1973 = vperm.xlu1 %3027, %v3147_v29   ;;  %v1764_v63 = vadd.f32 %v2582_v38, %v3829_v5  ;;  %v1765_v44 = vadd.f32 %v2583_v11, %v3836_v14  ;;  %v2648_v19 = vld [vmem:[%s3639_s10 + $0x28] sm:$0xff]  }
 0x2a3   : > { %v1634_v57 = vadd.f32 1.0, %v4018_v55  ;;  %v4023_v13 = vadd.f32 %v3910_v49, %v1277_v3  ;;  %v2586_v1 = vunpack.c.l.bf16 %v2648_v19 }
 0x2a4   : > { %v2037_v4 = vpack.c.bf16 %v1999_v31, %v1998_v22  ;;  %v2587_v22 = vunpack.c.h.bf16 %v2648_v19 }
 0x2a5   : > { %3152 = vrcp.f32 %v1634_v57  ;;  %v1635_v36 = vadd.f32 1.0, %v4023_v13  ;;  %v1819_v58 = vpop.permute.xlu0 %1818  ;;  %v1766_v37 = vadd.f32 %v2586_v1, %v3844_v40  ;;  %v2652_v1 = vld [vmem:[%s3639_s10 + $0x48] sm:$0xff]  }
 0x2a6   : > { %2792 = vmatmul.mubr.bf16.vlgmr.msra.gmra.mrb[80].mxu1 %v2037_v4  ;;  %v2000_v47 = vmul.f32 %v1819_v58, %v1760_v39  ;;  %v1767_v57 = vadd.f32 %v2587_v22, %v4291_v21  ;;  %v2602_v21 = vunpack.c.l.bf16 %v2652_v1 }
 0x2a7   : > { %v3149_v59 = vpop.eup %3148  ;;  %3154 = vrcp.f32 %v1635_v36  ;;  %v1824_v6 = vpop.permute.xlu1 %1823  ;;  %v2649_v36 = vld [vmem:[%s3639_s10 + $0x30] sm:$0xff]  }
 0x2a8   : > { %v2001_v16 = vmul.f32 %v1824_v6, %v1761_v34  ;;  %1978 = vperm.xlu0 %3026, %v3149_v59   ;;  %v2590_v14 = vunpack.c.l.bf16 %v2649_v36  ;;  %v2591_v34 = vunpack.c.h.bf16 %v2649_v36  ;;  %v4292_v6 = vld [vmem:[#allocation22_spill] sm:$0xff]  ;;  %v4298_v36 = vld [vmem:[#allocation28_spill] sm:$0xff] }
 0x2a9   : > { %v3151_v49 = vpop.eup %3150 }
 0x2aa   : > { %v2038_v25 = vpack.c.bf16 %v2001_v16, %v2000_v47  ;;  %1983 = vperm.xlu1 %3027, %v3151_v49   ;;  %v1768_v23 = vadd.f32 %v2590_v14, %v4292_v6  ;;  %v4293_v47 = vld [vmem:[#allocation23_spill] sm:$0xff] }
 0x2ab   : > { %v1769_v16 = vadd.f32 %v2591_v34, %v4293_v47 }
 0x2ac   : > { %2795 = vmatprep.mubr.bf16.mxu1 %v2038_v25  ;;  %v2650_v25 = vld [vmem:[%s3639_s10 + $0x38] sm:$0xff]  }
 0x2ad   : > { %v1829_v45 = vpop.permute.xlu0 %1828 }
 0x2ae   : > { %v2002_v27 = vmul.f32 %v1829_v45, %v1762_v18  ;;  %v2594_v45 = vunpack.c.l.bf16 %v2650_v25  ;;  %v2595_v18 = vunpack.c.h.bf16 %v2650_v25 }
 0x2af   : > { %v3153_v32 = vpop.eup %3152  ;;  %v1834_v35 = vpop.permute.xlu1 %1833 }
 0x2b0   : > { %v2003_v17 = vmul.f32 %v1834_v35, %v1763_v48  ;;  %1988 = vperm.xlu0 %3026, %v3153_v32   ;;  %v4294_v32 = vld [vmem:[#allocation24_spill] sm:$0xff] }
 0x2b1   : > { %v3155_v52 = vpop.eup %3154  ;;  %v1770_v35 = vadd.f32 %v2594_v45, %v4294_v32 }
 0x2b2   : > { %v2039_v50 = vpack.c.bf16 %v2003_v17, %v2002_v27  ;;  %1993 = vperm.xlu1 %3027, %v3155_v52   ;;  %v1771_v27 = vadd.f32 %v2595_v18, %v4295_v20  ;;  %v2651_v52 = vld [vmem:[%s3639_s10 + $0x40] sm:$0xff]  }
 0x2b4   : > { %2796 = vmatmul.mubr.bf16.gmra.mrb[84].mxu1 %v2039_v50 }
 0x2b5   : > { %v1839_v43 = vpop.permute.xlu0 %1838 }
 0x2b6   : > { %v2004_v29 = vmul.f32 %v1839_v43, %v1764_v63  ;;  %v2598_v43 = vunpack.c.l.bf16 %v2651_v52  ;;  %v2599_v63 = vunpack.c.h.bf16 %v2651_v52 }
 0x2b7   : > { %v1844_v54 = vpop.permute.xlu1 %1843 }
 0x2b8   : > { %v2005_v3 = vmul.f32 %v1844_v54, %v1765_v44  ;;  %v4296_v54 = vld [vmem:[#allocation26_spill] sm:$0xff] }
 0x2b9   : > { %v1772_v19 = vadd.f32 %v2598_v43, %v4296_v54  ;;  %v2656_v54 = vld [vmem:[%s3639_s10 + $0x68] sm:$0xff]  }
 0x2ba   : > { %v2040_v26 = vpack.c.bf16 %v2005_v3, %v2004_v29  ;;  %v4297_v29 = vld [vmem:[#allocation27_spill] sm:$0xff] }
 0x2bb   : > { %v1773_v3 = vadd.f32 %v2599_v63, %v4297_v29 }
 0x2bc   : > { %2799 = vmatprep.mubr.bf16.mxu1 %v2040_v26 }
 0x2bd   : > { %v1849_v31 = vpop.permute.xlu0 %1848 }
 0x2be   : > { %v2006_v58 = vmul.f32 %v1849_v31, %v1766_v37 }
 0x2bf   : > { %v1854_v4 = vpop.permute.xlu1 %1853 }
 0x2c0   : > { %v2007_v5 = vmul.f32 %v1854_v4, %v1767_v57  ;;  %v2603_v57 = vunpack.c.h.bf16 %v2652_v1 }
 0x2c2   : > { %v2041_v39 = vpack.c.bf16 %v2007_v5, %v2006_v58  ;;  %v1774_v58 = vadd.f32 %v2602_v21, %v4298_v36  ;;  %v1775_v5 = vadd.f32 %v2603_v57, %v3914_v12 }
 0x2c4   : > { %2800 = vmatmul.mubr.bf16.gmra.mrb[88].mxu1 %v2041_v39 }
 0x2c5   : > { %v1859_v59 = vpop.permute.xlu0 %1858 }
 0x2c6   : > { %v2008_v33 = vmul.f32 %v1859_v59, %v1768_v23  ;;  %v2653_v59 = vld [vmem:[%s3639_s10 + $0x50] sm:$0xff]  }
 0x2c7   : > { %v1864_v49 = vpop.permute.xlu1 %1863  ;;  %v2606_v23 = vunpack.c.l.bf16 %v2653_v59  ;;  %v2607_v47 = vunpack.c.h.bf16 %v2653_v59 }
 0x2c8   : > { %v2009_v40 = vmul.f32 %v1864_v49, %v1769_v16 }
 0x2c9   : > { %v1776_v49 = vadd.f32 %v2606_v23, %v3921_v46  ;;  %v1777_v25 = vadd.f32 %v2607_v47, %v3926_v60 }
 0x2ca   : > { %v2042_v9 = vpack.c.bf16 %v2009_v40, %v2008_v33  ;;  %v2654_v40 = vld [vmem:[%s3639_s10 + $0x58] sm:$0xff]  }
 0x2cb   : > { %v2610_v12 = vunpack.c.l.bf16 %v2654_v40 }
 0x2cc   : > { %2803 = vmatprep.mubr.bf16.mxu1 %v2042_v9 }
 0x2cd   : > { %v1869_v48 = vpop.permute.xlu0 %1868 }
 0x2ce   : > { %v2010_v50 = vmul.f32 %v1869_v48, %v1770_v35  ;;  %v2611_v48 = vunpack.c.h.bf16 %v2654_v40  ;;  %v1778_v35 = vadd.f32 %v2610_v12, %v3931_v62 }
 0x2cf   : > { %v1874_v17 = vpop.permute.xlu1 %1873 }
 0x2d0   : > { %v2011_v38 = vmul.f32 %v1874_v17, %v1771_v27  ;;  %v1779_v20 = vadd.f32 %v2611_v48, %v3936_v10  ;;  %v2655_v17 = vld [vmem:[%s3639_s10 + $0x60] sm:$0xff]   ;;  %v2618_v10 = vunpack.c.l.bf16 %v2656_v54 }
 0x2d1   : > { %v2614_v60 = vunpack.c.l.bf16 %v2655_v17 }
 0x2d2   : > { %v2043_v11 = vpack.c.bf16 %v2011_v38, %v2010_v50  ;;  %v2615_v38 = vunpack.c.h.bf16 %v2655_v17  ;;  %v1782_v1 = vadd.f32 %v2618_v10, %v3951_v24 }
 0x2d3   : > { %v1780_v43 = vadd.f32 %v2614_v60, %v3942_v61  ;;  %v2661_v60 = vld [vmem:[%s3639_s10 + $0x90] sm:$0xff]  }
 0x2d4   : > { %2804 = vmatmul.mubr.bf16.gmra.mrb[92].mxu1 %v2043_v11  ;;  %v1781_v63 = vadd.f32 %v2615_v38, %v3946_v0 }
 0x2d5   : > { %v1879_v44 = vpop.permute.xlu0 %1878 }
 0x2d6   : > { %v2012_v22 = vmul.f32 %v1879_v44, %v1772_v19 }
 0x2d7   : > { %v1884_v26 = vpop.permute.xlu1 %1883 }
 0x2d8   : > { %v2013_v31 = vmul.f32 %v1884_v26, %v1773_v3  ;;  %v2619_v3 = vunpack.c.h.bf16 %v2656_v54 }
 0x2da   : > { %v2044_v37 = vpack.c.bf16 %v2013_v31, %v2012_v22  ;;  %v1783_v22 = vadd.f32 %v2619_v3, %v3956_v2 }
 0x2dc   : > { %2807 = vmatprep.mubr.bf16.mxu1 %v2044_v37  ;;  %v2657_v37 = vld [vmem:[%s3639_s10 + $0x70] sm:$0xff]  }
 0x2dd   : > { %v1889_v4 = vpop.permute.xlu0 %1888  ;;  %v2622_v0 = vunpack.c.l.bf16 %v2657_v37 }
 0x2de   : > { %v2014_v14 = vmul.f32 %v1889_v4, %v1774_v58  ;;  %v2623_v4 = vunpack.c.h.bf16 %v2657_v37 }
 0x2df   : > { %v1894_v39 = vpop.permute.xlu1 %1893  ;;  %v1784_v58 = vadd.f32 %v2622_v0, %v3962_v42 }
 0x2e0   : > { %v2015_v34 = vmul.f32 %v1894_v39, %v1775_v5  ;;  %v1785_v5 = vadd.f32 %v2623_v4, %v3966_v8 }
 0x2e2   : > { %v2045_v6 = vpack.c.bf16 %v2015_v34, %v2014_v14  ;;  %v2658_v14 = vld [vmem:[%s3639_s10 + $0x78] sm:$0xff]  }
 0x2e3   : > { %v2626_v2 = vunpack.c.l.bf16 %v2658_v14 }
 0x2e4   : > { %2808 = vmatmul.mubr.bf16.gmra.mrb[96].mxu1 %v2045_v6  ;;  %v2627_v6 = vunpack.c.h.bf16 %v2658_v14 }
 0x2e5   : > { %v1786_v47 = vadd.f32 %v2626_v2, %v3971_v7 }
 0x2e7   : > { %v1899_v16 = vpop.permute.xlu0 %1898 }
 0x2e8   : > { %v2016_v9 = vmul.f32 %v1899_v16, %v1776_v49  ;;  %v1787_v16 = vadd.f32 %v2627_v6, %v3976_v30 }
 0x2e9   : > { %v1904_v33 = vpop.permute.xlu1 %1903 }
 0x2ea   : > { %v2017_v45 = vmul.f32 %v1904_v33, %v1777_v25  ;;  %v2659_v25 = vld [vmem:[%s3639_s10 + $0x80] sm:$0xff]  }
 0x2eb   : > { %v2630_v8 = vunpack.c.l.bf16 %v2659_v25 }
 0x2ec   : > { %v2046_v18 = vpack.c.bf16 %v2017_v45, %v2016_v9  ;;  %v2631_v9 = vunpack.c.h.bf16 %v2659_v25 }
 0x2ee   : > { %2811 = vmatprep.mubr.bf16.mxu1 %v2046_v18  ;;  %v1788_v18 = vadd.f32 %v2630_v8, %v3982_v56  ;;  %v1789_v12 = vadd.f32 %v2631_v9, %v3986_v15  ;;  %v2638_v15 = vunpack.c.l.bf16 %v2661_v60 }
 0x2ef   : > { %v1909_v32 = vpop.permute.xlu0 %1908 }
 0x2f0   : > { %v2018_v52 = vmul.f32 %v1909_v32, %v1778_v35  ;;  %v2660_v32 = vld [vmem:[%s3639_s10 + $0x88] sm:$0xff]  }
 0x2f1   : > { %v1914_v27 = vpop.permute.xlu1 %1913  ;;  %v2634_v30 = vunpack.c.l.bf16 %v2660_v32 }
 0x2f2   : > { %v2019_v46 = vmul.f32 %v1914_v27, %v1779_v20  ;;  %v2635_v27 = vunpack.c.h.bf16 %v2660_v32 }
 0x2f4   : > { %v2047_v50 = vpack.c.bf16 %v2019_v46, %v2018_v52  ;;  %v1790_v52 = vadd.f32 %v2634_v30, %v3991_v51  ;;  %v1791_v46 = vadd.f32 %v2635_v27, %v3997_v53 }
 0x2f6   : > { %2812 = vmatmul.mubr.bf16.gmra.mrb[100].mxu1 %v2047_v50 }
 0x2f7   : > { %v1919_v11 = vpop.permute.xlu0 %1918 }
 0x2f8   : > { %v2020_v19 = vmul.f32 %v1919_v11, %v1780_v43  ;;  %v2639_v43 = vunpack.c.h.bf16 %v2661_v60 }
 0x2f9   : > { %v1924_v44 = vpop.permute.xlu1 %1923 }
 0x2fa   : > { %v2021_v62 = vmul.f32 %v1924_v44, %v1781_v63  ;;  %v1792_v44 = vadd.f32 %v2638_v15, %v4004_v41  ;;  %v1793_v54 = vadd.f32 %v2639_v43, %v4010_v28  ;;  %v4083_v28 = vld [vmem:[%s4227_s4] ss:$0 sm:$0xff] }
 0x2fc   : > { %v2048_v29 = vpack.c.bf16 %v2021_v62, %v2020_v19  ;;  %v2662_v62 = vld [vmem:[%s3639_s10 + $0x98] sm:$0xff]  }
 0x2fd   : > { %v2642_v53 = vunpack.c.l.bf16 %v2662_v62  ;;  %v2643_v3 = vunpack.c.h.bf16 %v2662_v62 }
 0x2fe   : > { %2815 = vmatprep.mubr.bf16.mxu1 %v2048_v29 }
 0x2ff   : > { %v1929_v26 = vpop.permute.xlu0 %1928 }
 0x300   : > { %v2022_v21 = vmul.f32 %v1929_v26, %v1782_v1  ;;  %v1794_v1 = vadd.f32 %v2642_v53, %v4018_v55 }
 0x301   : > { %v1934_v31 = vpop.permute.xlu1 %1933 }
 0x302   : > { %v2023_v61 = vmul.f32 %v1934_v31, %v1783_v22  ;;  %v1795_v22 = vadd.f32 %v2643_v3, %v4023_v13 }
 0x304   : > { %v2049_v57 = vpack.c.bf16 %v2023_v61, %v2022_v21 }
 0x306   : > { %2816 = vmatmul.mubr.bf16.gmra.mrb[104].mxu1 %v2049_v57 }
 0x307   : > { %v1939_v36 = vpop.permute.xlu0 %1938 }
 0x308   : > { %v2024_v34 = vmul.f32 %v1939_v36, %v1784_v58 }
 0x309   : > { %v1944_v39 = vpop.permute.xlu1 %1943 }
 0x30a   : > { %v2025_v24 = vmul.f32 %v1944_v39, %v1785_v5 }
 0x30c   : > { %v2050_v59 = vpack.c.bf16 %v2025_v24, %v2024_v34 }
 0x30e   : > { %2819 = vmatprep.mubr.bf16.mxu1 %v2050_v59 }
 0x30f   : > { %v1949_v23 = vpop.permute.xlu0 %1948 }
 0x310   : > { %v2026_v33 = vmul.f32 %v1949_v23, %v1786_v47 }
 0x311   : > { %v1954_v49 = vpop.permute.xlu1 %1953 }
 0x312   : > { %v2027_v42 = vmul.f32 %v1954_v49, %v1787_v16 }
 0x314   : > { %v2051_v40 = vpack.c.bf16 %v2027_v42, %v2026_v33 }
 0x316   : > { %2820 = vmatmul.mubr.bf16.gmra.mrb[108].mxu1 %v2051_v40 }
 0x317   : > { %v1959_v45 = vpop.permute.xlu0 %1958 }
 0x318   : > { %v2028_v35 = vmul.f32 %v1959_v45, %v1788_v18 }
 0x319   : > { %v1964_v48 = vpop.permute.xlu1 %1963 }
 0x31a   : > { %v2029_v7 = vmul.f32 %v1964_v48, %v1789_v12 }
 0x31c   : > { %v2052_v20 = vpack.c.bf16 %v2029_v7, %v2028_v35 }
 0x31e   : > { %2823 = vmatprep.mubr.bf16.mxu1 %v2052_v20 }
 0x31f   : > { %v1969_v17 = vpop.permute.xlu0 %1968 }
 0x320   : > { %v2030_v38 = vmul.f32 %v1969_v17, %v1790_v52 }
 0x321   : > { %v1974_v50 = vpop.permute.xlu1 %1973 }
 0x322   : > { %v2031_v56 = vmul.f32 %v1974_v50, %v1791_v46 }
 0x324   : > { %v2053_v11 = vpack.c.bf16 %v2031_v56, %v2030_v38 }
 0x326   : > { %2824 = vmatmul.mubr.bf16.gmra.mrb[112].mxu1 %v2053_v11 }
 0x327   : > { %v1979_v63 = vpop.permute.xlu0 %1978 }
 0x328   : > { %v2032_v29 = vmul.f32 %v1979_v63, %v1792_v44 }
 0x329   : > { %v1984_v19 = vpop.permute.xlu1 %1983 }
 0x32a   : > { %v2033_v51 = vmul.f32 %v1984_v19, %v1793_v54 }
 0x32c   : > { %v2054_v10 = vpack.c.bf16 %v2033_v51, %v2032_v29 }
 0x32e   : > { %2827 = vmatprep.mubr.bf16.mxu1 %v2054_v10 }
 0x32f   : > { %v1989_v26 = vpop.permute.xlu0 %1988 }
 0x330   : > { %v2034_v37 = vmul.f32 %v1989_v26, %v1794_v1 }
 0x331   : > { %v1994_v31 = vpop.permute.xlu1 %1993 }
 0x332   : > { %v2035_v21 = vmul.f32 %v1994_v31, %v1795_v22 }
 0x334   : > { %v2055_v41 = vpack.c.bf16 %v2035_v21, %v2034_v37 }
 0x336   : > { %2828 = vmatmul.mubr.bf16.gmra.mrb[116].mxu1 %v2055_v41 }
 0x379   : > { %v2793_v61 = vpop.f32.mrb[80].mxu1 }
 0x37a   : > { %v2170_v57 = vadd.f32 %v2793_v61, %v4083_v28  ;;  %v2161_v0 = vpop.f32.mrb[81].mxu1 }
 0x37b   : > { %v2162_v4 = vadd.f32 %v4083_v28, %v2161_v0  ;;  %v2794_v55 = vpop.f32.mrb[82].mxu1 }
 0x37c   : > { %2322 = vst [vmem:[%s4087_s0 + $0x10] sm:$0xff] %v2170_v57  ;;  %v2173_v13 = vadd.f32 %v2794_v55, %v4083_v28  ;;  %v2164_v36 = vpop.f32.mrb[83].mxu1 }
 0x37d   : > { %2320 = vst [vmem:[%s4087_s0] sm:$0xff] %v2162_v4  ;;  %v2165_v58 = vadd.f32 %v4083_v28, %v2164_v36 }
 0x37e   : > { %2323 = vst [vmem:[%s4087_s0 + $0x18] sm:$0xff] %v2173_v13 }
 0x37f   : > { %2321 = vst [vmem:[%s4087_s0 + $0x8] sm:$0xff] %v2165_v58 }
 0x387   : > { %v2797_v5 = vpop.f32.mrb[84].mxu1 }
 0x388   : > { %v2186_v39 = vadd.f32 %v2797_v5, %v4083_v28  ;;  %v2177_v14 = vpop.f32.mrb[85].mxu1 }
 0x389   : > { %v2178_v34 = vadd.f32 %v4083_v28, %v2177_v14  ;;  %v2798_v24 = vpop.f32.mrb[86].mxu1 }
 0x38a   : > { %2326 = vst [vmem:[%s4087_s0 + $0x30] sm:$0xff] %v2186_v39  ;;  %v2189_v59 = vadd.f32 %v2798_v24, %v4083_v28  ;;  %v2180_v2 = vpop.f32.mrb[87].mxu1 }
 0x38b   : > { %2324 = vst [vmem:[%s4087_s0 + $0x20] sm:$0xff] %v2178_v34  ;;  %v2181_v6 = vadd.f32 %v4083_v28, %v2180_v2 }
 0x38c   : > { %2327 = vst [vmem:[%s4087_s0 + $0x38] sm:$0xff] %v2189_v59 }
 0x38d   : > { %2325 = vst [vmem:[%s4087_s0 + $0x28] sm:$0xff] %v2181_v6 }
 0x397   : > { %v2801_v23 = vpop.f32.mrb[88].mxu1 }
 0x398   : > { %v2202_v47 = vadd.f32 %v2801_v23, %v4083_v28  ;;  %v2193_v16 = vpop.f32.mrb[89].mxu1 }
 0x399   : > { %v2194_v49 = vadd.f32 %v4083_v28, %v2193_v16  ;;  %v2802_v25 = vpop.f32.mrb[90].mxu1 }
 0x39a   : > { %2330 = vst [vmem:[%s4087_s0 + $0x50] sm:$0xff] %v2202_v47  ;;  %v2205_v33 = vadd.f32 %v2802_v25, %v4083_v28  ;;  %v2196_v42 = vpop.f32.mrb[91].mxu1 }
 0x39b   : > { %2328 = vst [vmem:[%s4087_s0 + $0x40] sm:$0xff] %v2194_v49  ;;  %v2197_v40 = vadd.f32 %v4083_v28, %v2196_v42 }
 0x39c   : > { %2331 = vst [vmem:[%s4087_s0 + $0x58] sm:$0xff] %v2205_v33 }
 0x39d   : > { %2329 = vst [vmem:[%s4087_s0 + $0x48] sm:$0xff] %v2197_v40 }
 0x3a7   : > { %v2805_v8 = vpop.f32.mrb[92].mxu1 }
 0x3a8   : > { %v2218_v9 = vadd.f32 %v2805_v8, %v4083_v28  ;;  %v2209_v45 = vpop.f32.mrb[93].mxu1 }
 0x3a9   : > { %v2210_v18 = vadd.f32 %v4083_v28, %v2209_v45  ;;  %v2806_v12 = vpop.f32.mrb[94].mxu1 }
 0x3aa   : > { %2334 = vst [vmem:[%s4087_s0 + $0x70] sm:$0xff] %v2218_v9  ;;  %v2221_v48 = vadd.f32 %v2806_v12, %v4083_v28  ;;  %v2212_v32 = vpop.f32.mrb[95].mxu1 }
 0x3ab   : > { %2332 = vst [vmem:[%s4087_s0 + $0x60] sm:$0xff] %v2210_v18  ;;  %v2213_v35 = vadd.f32 %v4083_v28, %v2212_v32 }
 0x3ac   : > { %2335 = vst [vmem:[%s4087_s0 + $0x78] sm:$0xff] %v2221_v48 }
 0x3ad   : > { %2333 = vst [vmem:[%s4087_s0 + $0x68] sm:$0xff] %v2213_v35 }
 0x3b7   : > { %v2809_v7 = vpop.f32.mrb[96].mxu1 }
 0x3b8   : > { %v2234_v20 = vadd.f32 %v2809_v7, %v4083_v28  ;;  %v2225_v30 = vpop.f32.mrb[97].mxu1 }
 0x3b9   : > { %v2226_v27 = vadd.f32 %v4083_v28, %v2225_v30  ;;  %v2810_v17 = vpop.f32.mrb[98].mxu1 }
 0x3ba   : > { %2338 = vst [vmem:[%s4087_s0 + $0x90] sm:$0xff] %v2234_v20  ;;  %v2237_v52 = vadd.f32 %v2810_v17, %v4083_v28  ;;  %v2228_v46 = vpop.f32.mrb[99].mxu1 }
 0x3bb   : > { %2336 = vst [vmem:[%s4087_s0 + $0x80] sm:$0xff] %v2226_v27  ;;  %v2229_v50 = vadd.f32 %v4083_v28, %v2228_v46 }
 0x3bc   : > { %2339 = vst [vmem:[%s4087_s0 + $0x98] sm:$0xff] %v2237_v52 }
 0x3bd   : > { %2337 = vst [vmem:[%s4087_s0 + $0x88] sm:$0xff] %v2229_v50 }
 0x3c9   : > { %v2813_v60 = vpop.f32.mrb[100].mxu1 }
 0x3ca   : > { %v2250_v38 = vadd.f32 %v2813_v60, %v4083_v28  ;;  %v2241_v56 = vpop.f32.mrb[101].mxu1 }
 0x3cb   : > { %v2242_v11 = vadd.f32 %v4083_v28, %v2241_v56  ;;  %v2814_v15 = vpop.f32.mrb[102].mxu1 }
 0x3cc   : > { %2342 = vst [vmem:[%s4087_s0 + $0xb0] sm:$0xff] %v2250_v38  ;;  %v2253_v43 = vadd.f32 %v2814_v15, %v4083_v28  ;;  %v2244_v63 = vpop.f32.mrb[103].mxu1 }
 0x3cd   : > { %2340 = vst [vmem:[%s4087_s0 + $0xa0] sm:$0xff] %v2242_v11  ;;  %v2245_v44 = vadd.f32 %v4083_v28, %v2244_v63 }
 0x3ce   : > { %2343 = vst [vmem:[%s4087_s0 + $0xb8] sm:$0xff] %v2253_v43 }
 0x3cf   : > { %2341 = vst [vmem:[%s4087_s0 + $0xa8] sm:$0xff] %v2245_v44 }
 0x3d9   : > { %v2817_v54 = vpop.f32.mrb[104].mxu1 }
 0x3da   : > { %v2266_v19 = vadd.f32 %v2817_v54, %v4083_v28  ;;  %v2257_v62 = vpop.f32.mrb[105].mxu1 }
 0x3db   : > { %v2258_v29 = vadd.f32 %v4083_v28, %v2257_v62  ;;  %v2818_v51 = vpop.f32.mrb[106].mxu1 }
 0x3dc   : > { %2346 = vst [vmem:[%s4087_s0 + $0xd0] sm:$0xff] %v2266_v19  ;;  %v2269_v10 = vadd.f32 %v2818_v51, %v4083_v28  ;;  %v2260_v53 = vpop.f32.mrb[107].mxu1 }
 0x3dd   : > { %2344 = vst [vmem:[%s4087_s0 + $0xc0] sm:$0xff] %v2258_v29  ;;  %v2261_v3 = vadd.f32 %v4083_v28, %v2260_v53 }
 0x3de   : > { %2347 = vst [vmem:[%s4087_s0 + $0xd8] sm:$0xff] %v2269_v10 }
 0x3df   : > { %2345 = vst [vmem:[%s4087_s0 + $0xc8] sm:$0xff] %v2261_v3 }
 0x3e9   : > { %v2821_v26 = vpop.f32.mrb[108].mxu1 }
 0x3ea   : > { %v2282_v1 = vadd.f32 %v2821_v26, %v4083_v28  ;;  %v2273_v22 = vpop.f32.mrb[109].mxu1 }
 0x3eb   : > { %v2274_v31 = vadd.f32 %v4083_v28, %v2273_v22  ;;  %v2822_v37 = vpop.f32.mrb[110].mxu1 }
 0x3ec   : > { %2350 = vst [vmem:[%s4087_s0 + $0xf0] sm:$0xff] %v2282_v1  ;;  %v2285_v21 = vadd.f32 %v2822_v37, %v4083_v28  ;;  %v2276_v41 = vpop.f32.mrb[111].mxu1 }
 0x3ed   : > { %2348 = vst [vmem:[%s4087_s0 + $0xe0] sm:$0xff] %v2274_v31  ;;  %v2277_v61 = vadd.f32 %v4083_v28, %v2276_v41 }
 0x3ee   : > { %2351 = vst [vmem:[%s4087_s0 + $0xf8] sm:$0xff] %v2285_v21 }
 0x3ef   : > { %2349 = vst [vmem:[%s4087_s0 + $0xe8] sm:$0xff] %v2277_v61 }
 0x3f9   : > { %v2825_v57 = vpop.f32.mrb[112].mxu1 }
 0x3fa   : > { %v2298_v0 = vadd.f32 %v2825_v57, %v4083_v28  ;;  %v2289_v4 = vpop.f32.mrb[113].mxu1 }
 0x3fb   : > { %v2290_v55 = vadd.f32 %v4083_v28, %v2289_v4  ;;  %v2826_v13 = vpop.f32.mrb[114].mxu1 }
 0x3fc   : > { %2354 = vst [vmem:[%s4087_s0 + $0x110] sm:$0xff] %v2298_v0  ;;  %v2301_v36 = vadd.f32 %v2826_v13, %v4083_v28  ;;  %v2292_v58 = vpop.f32.mrb[115].mxu1 }
 0x3fd   : > { %2352 = vst [vmem:[%s4087_s0 + $0x100] sm:$0xff] %v2290_v55  ;;  %v2293_v5 = vadd.f32 %v4083_v28, %v2292_v58 }
 0x3fe   : > { %2355 = vst [vmem:[%s4087_s0 + $0x118] sm:$0xff] %v2301_v36 }
 0x3ff   : > { %2353 = vst [vmem:[%s4087_s0 + $0x108] sm:$0xff] %v2293_v5 }
 0x409   : > { %v2829_v39 = vpop.f32.mrb[116].mxu1 }
 0x40a   : > { %v2314_v14 = vadd.f32 %v2829_v39, %v4083_v28  ;;  %v2305_v34 = vpop.f32.mrb[117].mxu1 }
 0x40b   : > { %v2306_v24 = vadd.f32 %v4083_v28, %v2305_v34  ;;  %v2830_v59 = vpop.f32.mrb[118].mxu1 }
 0x40c   : > { %2358 = vst [vmem:[%s4087_s0 + $0x130] sm:$0xff] %v2314_v14  ;;  %v2317_v2 = vadd.f32 %v2830_v59, %v4083_v28  ;;  %v2308_v6 = vpop.f32.mrb[119].mxu1 }
 0x40d   : > { %2356 = vst [vmem:[%s4087_s0 + $0x120] sm:$0xff] %v2306_v24  ;;  %v2309_v23 = vadd.f32 %v4083_v28, %v2308_v6 }
 0x40e   : > { %2359 = vst [vmem:[%s4087_s0 + $0x138] sm:$0xff] %v2317_v2 }
 0x40f   : > { %2357 = vst [vmem:[%s4087_s0 + $0x128] sm:$0xff] %v2309_v23 }
 0x410   : > { %3285 = shalt.err (!%p3282_p12)
}
 0x411   : > { %s3286_s29 = scalar_lea.hbm %s4168_s25, 5120  ;;  %s3290_s8 = scalar_lea.hbm %s4228_s5, 10240 }
 0x412   : > { %p3287_p8 = scmp.ne.s32.totalorder %s4168_s25, %s3286_s29  ;;  %p3291_p5 = scmp.lt.u32.totalorder %s4168_s25, %s4228_s5 }
 0x413   : > { %p3292_p9 = scmp.lt.u32.totalorder %s3290_s8, %s3286_s29  ;;  %p3294_p4 = scmp.lt.u32.totalorder %s3286_s29, %s4168_s25 }
 0x414   : > { %p3288_p0 = pnand %p3287_p8, %p4299_p6 }
 0x415   : > { %p3293_p2 = por %p3292_p9, %p3291_p5 }
 0x416   : > { %p3289_p7 = pneg %p3288_p0 }
 0x417   : > { %p3295_p10 = por %p3294_p4, %p3293_p2 }
 0x419   : > { %p3296_p3 = pnand %p3295_p10, %p3289_p7 }
 0x41b   : > { %3299 = shalt.err (!%p3296_p3)
}
 0x41c   : > { %s3379_s28 = smov 128   ;;  %s3380_s10 = smov 8  }
 0x41d   : > { %2941 = dma.vmem_to_hbm [thread:$0]  (%p4299_p6), %s4170_s7, 5120, %s4168_s25, %s2361_s21, %s3379_s28, %s3379_s28, %s3380_s10  }
 0x41e PF: > { %s4300_s24 = sld [smem:[#allocation18_spill]]  ;;  %s4301_s26 = sld [smem:[#allocation17_spill]] }
 0x41f   : > { %s2389_s11 = sand.u32 1, %s3346_s18  }
 0x420   : > { %s2390_s0 = scalar_lea.sflag [#allocation5], %s2389_s11 }
 0x424   : > { %p4302_p13 = scmp.ne.s32.totalorder %s4300_s24, 0  ;;  %p4303_p1 = scmp.ge.s32.totalorder %s4301_s26, 2 }
 0x426   : > { %p2958_p11 = pnand %p4303_p1, %p4302_p13 }
 0x428   : > { %3341 = dma.done.wait (!%p2958_p11), %s2390_s0, 5120  }
 0x429   : > { %3343 = vsyncadd (!%p2958_p11), %s2390_s0, 4294962176  ;;  %s22_s23 = sadd.s32 1, %s4301_s26   ;;  %s4304_s20 = sld [smem:[#allocation16_spill]] }
 0x42a   : > { %p19_p12 = scmp.ge.s32.totalorder %s22_s23, 4   ;;  %s4305_s13 = sld [smem:[#allocation20_spill]] }
 0x42b   : > { %s4306_s9 = sld [smem:[#allocation19_spill]]  ;;  %s4307_s18 = smov %s3350_s19 }
 0x42c   : > { %s4310_s21 = smov %s3362_s22  ;;  %21 = sbr.rel (!%p19_p12) target bundleno = 10 (0xa), region = 113 }
 0x42f   : > { %s4308_s19 = smov %s4304_s20 }
 0x430   : > { %s4309_s20 = smov %s4305_s13 }
 0x431   : > { %s4311_s22 = smov %s4306_s9 }
 0x433   :  { %2395 = vsyncpa [#allocation4], 1 }
 0x434   :  { %2397 = vsyncpa [#allocation4 + $0x1], 1 }
 0x435   :  { %2398 = vsyncpa [#allocation7], 1 }
 0x436   :  { %2399 = vsyncpa [#allocation5], 1 }
 0x437   :  { %2401 = vsyncpa [#allocation5 + $0x1], 1 }

</bundles_post_ra>
